<compile_context>
chip_gen: v7x
topology: tpu7x:2x2x1
jax: 0.10.0
libtpu: 0.0.40
codegen_flags: <defaults>
</compile_context>

<pallas_src>
import functools

import jax
import jax.numpy as jnp
from jax.experimental import pallas as pl
from jax.experimental.pallas import tpu as pltpu

# ------------------------- config (small synthetic) -------------------------
NUM_CLASSES = 5
HIDDEN = 32
NUM_QUERIES = 8
NUM_HEADS = 2
PATCH = 4
FFN_DIM = 64
NUM_DECODER_LAYERS = 2
CLS_PAD = 128          # lane-dense padded width for the class-logits output

# MXU operand dtype (accumulation is always f32).  On v5e at these sub-tile
# matmul shapes f32 would avoid cast overhead; bf16 is right for v6e/v7x.
MXU_DTYPE = jnp.bfloat16


# --------------------------- in-kernel helper math ---------------------------
def _dot(a, b, dn=None):
    """MXU matmul with MXU_DTYPE operands and f32 accumulation."""
    a = a.astype(MXU_DTYPE)
    b = b.astype(MXU_DTYPE)
    if dn is None:
        return jnp.dot(a, b, preferred_element_type=jnp.float32)
    return jax.lax.dot_general(a, b, dn, preferred_element_type=jnp.float32)


def _layernorm(x, g, b):
    """f32 LayerNorm over the last dim (eps matches PyTorch's 1e-5)."""
    mu = jnp.mean(x, axis=-1, keepdims=True)
    var = jnp.mean(jnp.square(x - mu), axis=-1, keepdims=True)
    return (x - mu) * jax.lax.rsqrt(var + 1e-5) * g + b


# ------------------------------ the fused kernel ------------------------------
def _mask2former_kernel(
    # -------- inputs --------
    patches_ref,                                          # (T, C*P*P)   per batch
    patch_w, patch_b, pln_g, pln_b, pix_w, pix_b,          # backbone / pixel decoder
    qfeat_ref, qpos_ref,                                   # (Nq, D) each
    ca_qkv_w, ca_qkv_b, ca_o_w, ca_o_b, ca_g, ca_beta,     # cross-attn   (this layer)
    sa_qkv_w, sa_qkv_b, sa_o_w, sa_o_b, sa_g, sa_beta,     # self-attn    (this layer)
    f_w1, f_b1, f_w2, f_b2, f_g, f_beta,                   # FFN          (this layer)
    cls_w, cls_b, m1w, m1b, m2w, m2b, m3w, m3b,            # heads
    # -------- outputs --------
    cls_ref, mask_ref,
    # -------- scratch (resident across the layer grid axis) --------
    q_scr, mem_scr,
    *, Nq, T, D, H,
):
    l = pl.program_id(1)
    hd = D // H
    scale = 1.0 / (hd ** 0.5)

    # ---- l == 0: patch-embed matmul + LN + pixel-decoder projection (GELU),
    #      and query initialization.  Both stay resident in VMEM scratch. ----
    # TODO(synk): the real backbone is a Swin-L hierarchical transformer and
    # the real pixel decoder uses multi-scale deformable attention; both are
    # reduced to one fused projection here.
    @pl.when(l == 0)
    def _init():
        xx = _dot(patches_ref[...], patch_w[...]) + patch_b[...]
        xx = _layernorm(xx, pln_g[...], pln_b[...])
        yy = _dot(xx, pix_w[...]) + pix_b[...]
        mem_scr[...] = jax.nn.gelu(yy).astype(mem_scr.dtype)   # cast to bf16 ONCE
        q_scr[...] = qfeat_ref[...]

    queries = q_scr[...]                      # (Nq, D) f32, carried across layers
    qpos = qpos_ref[...]                      # (Nq, D) f32
    mem = mem_scr[...]                        # (T, D)  MXU dtype (cast once)

    def split_heads(x, n):
        # (n, D) -> (H, n, hd): heads become the batch dim of the dot_general
        return x.reshape(n, H, hd).transpose(1, 0, 2)

    def mha(q_in, k_in, v_in, n_k, qkv_w, qkv_b, o_w, o_b):
        # merged QKV stored as (3, D, D) / (3, 1, D): leading-axis Ref indexing
        Q = _dot(q_in, qkv_w[0]) + qkv_b[0]    # (Nq, D)  f32
        K = _dot(k_in, qkv_w[1]) + qkv_b[1]    # (n_k, D) f32
        V = _dot(v_in, qkv_w[2]) + qkv_b[2]    # (n_k, D) f32
        Qh = split_heads(Q * scale, Nq)        # (H, Nq, hd)
        Kh = split_heads(K, n_k)               # (H, n_k, hd)
        Vh = split_heads(V, n_k)               # (H, n_k, hd)
        # one batched QK^T and one batched P.V (batch dim = heads)
        s = _dot(Qh, Kh, (((2,), (2,)), ((0,), (0,))))          # (H, Nq, n_k) f32
        s_max = jnp.max(s, axis=-1, keepdims=True)
        p = jnp.exp(s - s_max)
        denom = jnp.sum(p, axis=-1, keepdims=True)
        p = p * pl.reciprocal(denom, approx=True)               # EUP, off the VALU
        o = _dot(p, Vh, (((2,), (1,)), ((0,), (0,))))           # (H, Nq, hd)
        o = o.transpose(1, 0, 2).reshape(Nq, D)
        return _dot(o, o_w[...]) + o_b[...]

    # masked cross-attention over the per-pixel memory.
    # TODO(synk): the per-layer predicted attention mask and key position/level
    # embeddings of real Mask2Former are omitted.
    q_pos = queries + qpos
    ca = mha(q_pos, mem, mem, T, ca_qkv_w, ca_qkv_b, ca_o_w, ca_o_b)
    queries = _layernorm(queries + ca, ca_g[...], ca_beta[...])

    # self-attention among queries (positions added to q/k only, not to v)
    q_pos = queries + qpos
    sa = mha(q_pos, q_pos, queries, Nq, sa_qkv_w, sa_qkv_b, sa_o_w, sa_o_b)
    queries = _layernorm(queries + sa, sa_g[...], sa_beta[...])

    # FFN (relu) + residual + LayerNorm
    h1 = jnp.maximum(_dot(queries, f_w1[...]) + f_b1[...], 0.0)
    h2 = _dot(h1, f_w2[...]) + f_b2[...]
    queries = _layernorm(queries + h2, f_g[...], f_beta[...])

    q_scr[...] = queries

    # ---- last layer: class head + 3-layer mask MLP + mask contraction ----
    @pl.when(l == pl.num_programs(1) - 1)
    def _heads():
        # class head weight is zero-padded to CLS_PAD lanes -> lane-dense store
        cls_ref[...] = (_dot(queries, cls_w[...]) + cls_b[...]).astype(cls_ref.dtype)
        m = jnp.maximum(_dot(queries, m1w[...]) + m1b[...], 0.0)
        m = jnp.maximum(_dot(m, m2w[...]) + m2b[...], 0.0)
        m = _dot(m, m3w[...]) + m3b[...]                        # (Nq, D)
        # 'qd,td->qt' in-kernel; no HBM-materialized transpose of memory.
        # TODO(synk): at real sizes T = (H/4)*(W/4) >= 128 so this store is
        # naturally lane-dense; at the toy T=16 it is a single masked vst.
        mask_ref[...] = _dot(m, mem,
                             (((1,), (1,)), ((), ()))).astype(mask_ref.dtype)


# ------------------------------ Pallas wrapper ------------------------------
def mask2former_forward(params, x):
    """x: (B, 3, H, W) NCHW float32 -> dict of class / mask query logits."""
    B, C, Himg, Wimg = x.shape
    Hp, Wp = Himg // PATCH, Wimg // PATCH
    T = Hp * Wp
    CPP = C * PATCH * PATCH
    Nq, D, F, L = NUM_QUERIES, HIDDEN, FFN_DIM, NUM_DECODER_LAYERS

    # im2col for the patch-embed conv (k=4, s=4): pure layout op, done in XLA.
    patches = x.reshape(B, C, Hp, PATCH, Wp, PATCH)
    patches = patches.transpose(0, 2, 4, 1, 3, 5).reshape(B, T, CPP)

    p = params
    args = [
        patches,
        p["patch_w"], p["patch_b"], p["patch_ln_g"], p["patch_ln_b"],
        p["pix_w"], p["pix_b"],
        p["query_feat"], p["query_pos"],
        p["ca_qkv_w"], p["ca_qkv_b"], p["ca_o_w"], p["ca_o_b"], p["ca_ln_g"], p["ca_ln_b"],
        p["sa_qkv_w"], p["sa_qkv_b"], p["sa_o_w"], p["sa_o_b"], p["sa_ln_g"], p["sa_ln_b"],
        p["ffn_w1"], p["ffn_b1"], p["ffn_w2"], p["ffn_b2"], p["ffn_ln_g"], p["ffn_ln_b"],
        p["cls_w"], p["cls_b"],
        p["mask_w1"], p["mask_b1"], p["mask_w2"], p["mask_b2"], p["mask_w3"], p["mask_b3"],
    ]

    def const_spec(shape):
        nd = len(shape)
        return pl.BlockSpec(tuple(shape), lambda b, l: (0,) * nd)

    def batch_spec(shape):
        nd = len(shape)
        return pl.BlockSpec((None,) + tuple(shape[1:]),
                            lambda b, l: (b,) + (0,) * (nd - 1))

    def layer_spec(shape):
        nd = len(shape)
        return pl.BlockSpec((None,) + tuple(shape[1:]),
                            lambda b, l: (l,) + (0,) * (nd - 1))

    in_specs = (
        [batch_spec(patches.shape)]                       # per-batch patches
        + [const_spec(a.shape) for a in args[1:9]]        # backbone + queries
        + [layer_spec(a.shape) for a in args[9:27]]       # per-layer weights
        + [const_spec(a.shape) for a in args[27:]]        # head weights
    )

    out_shape = (
        jax.ShapeDtypeStruct((B, Nq, CLS_PAD), jnp.float32),
        jax.ShapeDtypeStruct((B, Nq, T), jnp.float32),
    )
    out_specs = (
        pl.BlockSpec((None, Nq, CLS_PAD), lambda b, l: (b, 0, 0)),
        pl.BlockSpec((None, Nq, T), lambda b, l: (b, 0, 0)),
    )

    kernel = functools.partial(_mask2former_kernel, Nq=Nq, T=T, D=D, H=NUM_HEADS)

    # Advisory cost estimate so XLA can schedule around the custom call.
    flops = int(B * (
        2 * T * CPP * D + 2 * T * D * D                         # backbone / pixel proj
        + L * (2 * (Nq + 2 * T + 3 * Nq) * D * D                # QKV + out projections
               + 4 * Nq * (T + Nq) * D                          # attention
               + 4 * Nq * D * F)                                # FFN
        + 2 * Nq * D * (CLS_PAD + 3 * D + T)))                  # heads
    ce = pl.CostEstimate(
        flops=flops,
        transcendentals=int(B * (T * D + L * Nq * (T + Nq))),
        bytes_accessed=int(sum(a.size * a.dtype.itemsize for a in args)
                           + B * Nq * (CLS_PAD + T) * 4),
    )

    cls_pad, mask2d = pl.pallas_call(
        kernel,
        out_shape=out_shape,
        grid=(B, L),
        in_specs=in_specs,
        out_specs=out_specs,
        scratch_shapes=[
            pltpu.VMEM((Nq, D), jnp.float32),   # queries, resident across layers
            pltpu.VMEM((T, D), MXU_DTYPE),      # per-pixel memory, cast to bf16 once
        ],
        compiler_params=pltpu.CompilerParams(
            dimension_semantics=("parallel", "arbitrary"),
            vmem_limit_bytes=32 * 1024 * 1024,
        ),
        cost_estimate=ce,
    )(*args)

    return {
        "class_queries_logits": cls_pad[:, :, : NUM_CLASSES + 1],
        "masks_queries_logits": mask2d.reshape(B, Nq, Hp, Wp),
    }


# ------------------------------ parameter init ------------------------------
def init_params(key):
    keys = iter(jax.random.split(key, 64))

    def w(shape, scale=0.02):
        return (scale * jax.random.normal(next(keys), shape)).astype(jnp.float32)

    def zeros(shape):
        return jnp.zeros(shape, jnp.float32)

    def ones(shape):
        return jnp.ones(shape, jnp.float32)

    D, F, L = HIDDEN, FFN_DIM, NUM_DECODER_LAYERS
    p = {}
    # backbone patch embedding (conv k=4 s=4 expressed as im2col matmul)
    p["patch_w"] = w((3 * PATCH * PATCH, D))
    p["patch_b"] = zeros((1, D))
    p["patch_ln_g"] = ones((1, D))
    p["patch_ln_b"] = zeros((1, D))
    # pixel decoder projection
    p["pix_w"] = w((D, D))
    p["pix_b"] = zeros((1, D))
    # learned queries
    p["query_feat"] = w((NUM_QUERIES, D))
    p["query_pos"] = w((NUM_QUERIES, D))
    # decoder layers, stacked along a leading L axis; QKV merged on a leading 3
    for name in ("ca", "sa"):
        p[f"{name}_qkv_w"] = w((L, 3, D, D))
        p[f"{name}_qkv_b"] = zeros((L, 3, 1, D))
        p[f"{name}_o_w"] = w((L, D, D))
        p[f"{name}_o_b"] = zeros((L, 1, D))
        p[f"{name}_ln_g"] = ones((L, 1, D))
        p[f"{name}_ln_b"] = zeros((L, 1, D))
    p["ffn_w1"] = w((L, D, F)); p["ffn_b1"] = zeros((L, 1, F))
    p["ffn_w2"] = w((L, F, D)); p["ffn_b2"] = zeros((L, 1, D))
    p["ffn_ln_g"] = ones((L, 1, D)); p["ffn_ln_b"] = zeros((L, 1, D))
    # heads; class head zero-padded to CLS_PAD lanes for a lane-dense store
    cls_w = w((D, NUM_CLASSES + 1)); cls_b = zeros((1, NUM_CLASSES + 1))
    p["cls_w"] = jnp.zeros((D, CLS_PAD), jnp.float32).at[:, : NUM_CLASSES + 1].set(cls_w)
    p["cls_b"] = jnp.zeros((1, CLS_PAD), jnp.float32).at[:, : NUM_CLASSES + 1].set(cls_b)
    p["mask_w1"] = w((D, D)); p["mask_b1"] = zeros((1, D))
    p["mask_w2"] = w((D, D)); p["mask_b2"] = zeros((1, D))
    p["mask_w3"] = w((D, D)); p["mask_b3"] = zeros((1, D))
    return p


# ------------------------- pure-JAX reference (f32) -------------------------
def _reference_forward(params, x):
    B, C, Himg, Wimg = x.shape
    Hp, Wp = Himg // PATCH, Wimg // PATCH
    T = Hp * Wp
    D, hd = HIDDEN, HIDDEN // NUM_HEADS

    patches = x.reshape(B, C, Hp, PATCH, Wp, PATCH)
    patches = patches.transpose(0, 2, 4, 1, 3, 5).reshape(B, T, C * PATCH * PATCH)

    def ln(v, g, b):
        mu = jnp.mean(v, -1, keepdims=True)
        var = jnp.mean((v - mu) ** 2, -1, keepdims=True)
        return (v - mu) * jax.lax.rsqrt(var + 1e-5) * g + b

    mem = patches @ params["patch_w"] + params["patch_b"]
    mem = ln(mem, params["patch_ln_g"], params["patch_ln_b"])
    mem = jax.nn.gelu(mem @ params["pix_w"] + params["pix_b"])          # (B, T, D)

    q = jnp.broadcast_to(params["query_feat"], (B, NUM_QUERIES, D))
    qpos = params["query_pos"]

    def mha(q_in, k_in, v_in, wqkv, bqkv, wo, bo):
        Q = q_in @ wqkv[0] + bqkv[0]
        K = k_in @ wqkv[1] + bqkv[1]
        V = v_in @ wqkv[2] + bqkv[2]

        def split(v):
            Bn, N, _ = v.shape
            return v.reshape(Bn, N, NUM_HEADS, hd).transpose(0, 2, 1, 3)

        Qh, Kh, Vh = split(Q), split(K), split(V)
        s = (Qh @ Kh.transpose(0, 1, 3, 2)) / (hd ** 0.5)
        pr = jax.nn.softmax(s, axis=-1)
        o = (pr @ Vh).transpose(0, 2, 1, 3).reshape(q_in.shape[0], q_in.shape[1], D)
        return o @ wo + bo

    for i in range(NUM_DECODER_LAYERS):
        ca = mha(q + qpos, mem, mem, params["ca_qkv_w"][i], params["ca_qkv_b"][i],
                 params["ca_o_w"][i], params["ca_o_b"][i])
        q = ln(q + ca, params["ca_ln_g"][i], params["ca_ln_b"][i])
        qk = q + qpos
        sa = mha(qk, qk, q, params["sa_qkv_w"][i], params["sa_qkv_b"][i],
                 params["sa_o_w"][i], params["sa_o_b"][i])
        q = ln(q + sa, params["sa_ln_g"][i], params["sa_ln_b"][i])
        h1 = jax.nn.relu(q @ params["ffn_w1"][i] + params["ffn_b1"][i])
        q = ln(q + h1 @ params["ffn_w2"][i] + params["ffn_b2"][i],
               params["ffn_ln_g"][i], params["ffn_ln_b"][i])

    cls = q @ params["cls_w"][:, : NUM_CLASSES + 1] + params["cls_b"][:, : NUM_CLASSES + 1]
    m = jax.nn.relu(q @ params["mask_w1"] + params["mask_b1"])
    m = jax.nn.relu(m @ params["mask_w2"] + params["mask_b2"])
    m = m @ params["mask_w3"] + params["mask_b3"]
    mask = jnp.einsum('bqd,btd->bqt', m, mem)
    return {
        "class_queries_logits": cls,
        "masks_queries_logits": mask.reshape(B, NUM_QUERIES, Hp, Wp),
    }


# ----------------------------------- main ------------------------------------
if __name__ == "__main__":
    key = jax.random.PRNGKey(0)
    pkey, xkey = jax.random.split(key)
    params = init_params(pkey)
    x = jax.random.normal(xkey, (2, 3, 16, 16), dtype=jnp.float32)  # NCHW like PyTorch

    out = jax.jit(mask2former_forward)(params, x)
    jax.block_until_ready(out)

    assert out["class_queries_logits"].shape == (2, NUM_QUERIES, NUM_CLASSES + 1)
    assert out["masks_queries_logits"].shape == (2, NUM_QUERIES, 4, 4)
    assert jnp.isfinite(out["class_queries_logits"]).all()
    assert jnp.isfinite(out["masks_queries_logits"]).all()

    # tolerance check vs a pure-f32 JAX reference (bf16 MXU feeds + approx
    # reciprocal mean results are close but not bit-exact)
    ref = _reference_forward(params, x)
    for name in out:
        err = float(jnp.max(jnp.abs(out[name] - ref[name])))
        assert err < 5e-2, (name, err)

    print("KERNEL_OK")
</pallas_src>

<mosaic_0001>
module attributes {stable_mosaic.version = 11 : i64} {
  func.func @_mask2former_kernel(%arg0: i32, %arg1: i32, %arg2: memref<1x16x48xf32, #tpu.memory_space<vmem>>, %arg3: memref<48x32xf32, #tpu.memory_space<vmem>>, %arg4: memref<1x32xf32, #tpu.memory_space<vmem>>, %arg5: memref<1x32xf32, #tpu.memory_space<vmem>>, %arg6: memref<1x32xf32, #tpu.memory_space<vmem>>, %arg7: memref<32x32xf32, #tpu.memory_space<vmem>>, %arg8: memref<1x32xf32, #tpu.memory_space<vmem>>, %arg9: memref<8x32xf32, #tpu.memory_space<vmem>>, %arg10: memref<8x32xf32, #tpu.memory_space<vmem>>, %arg11: memref<1x3x32x32xf32, #tpu.memory_space<vmem>>, %arg12: memref<1x3x1x32xf32, #tpu.memory_space<vmem>>, %arg13: memref<1x32x32xf32, #tpu.memory_space<vmem>>, %arg14: memref<1x1x32xf32, #tpu.memory_space<vmem>>, %arg15: memref<1x1x32xf32, #tpu.memory_space<vmem>>, %arg16: memref<1x1x32xf32, #tpu.memory_space<vmem>>, %arg17: memref<1x3x32x32xf32, #tpu.memory_space<vmem>>, %arg18: memref<1x3x1x32xf32, #tpu.memory_space<vmem>>, %arg19: memref<1x32x32xf32, #tpu.memory_space<vmem>>, %arg20: memref<1x1x32xf32, #tpu.memory_space<vmem>>, %arg21: memref<1x1x32xf32, #tpu.memory_space<vmem>>, %arg22: memref<1x1x32xf32, #tpu.memory_space<vmem>>, %arg23: memref<1x32x64xf32, #tpu.memory_space<vmem>>, %arg24: memref<1x1x64xf32, #tpu.memory_space<vmem>>, %arg25: memref<1x64x32xf32, #tpu.memory_space<vmem>>, %arg26: memref<1x1x32xf32, #tpu.memory_space<vmem>>, %arg27: memref<1x1x32xf32, #tpu.memory_space<vmem>>, %arg28: memref<1x1x32xf32, #tpu.memory_space<vmem>>, %arg29: memref<32x128xf32, #tpu.memory_space<vmem>>, %arg30: memref<1x128xf32, #tpu.memory_space<vmem>>, %arg31: memref<32x32xf32, #tpu.memory_space<vmem>>, %arg32: memref<1x32xf32, #tpu.memory_space<vmem>>, %arg33: memref<32x32xf32, #tpu.memory_space<vmem>>, %arg34: memref<1x32xf32, #tpu.memory_space<vmem>>, %arg35: memref<32x32xf32, #tpu.memory_space<vmem>>, %arg36: memref<1x32xf32, #tpu.memory_space<vmem>>, %arg37: memref<1x8x128xf32, #tpu.memory_space<vmem>>, %arg38: memref<1x8x16xf32, #tpu.memory_space<vmem>>, %arg39: memref<8x32xf32, #tpu.memory_space<vmem>>, %arg40: memref<16x32xbf16, #tpu.memory_space<vmem>>) attributes {dimension_semantics = [#tpu.dimension_semantics<parallel>, #tpu.dimension_semantics<arbitrary>], iteration_bounds = array<i64: 2, 2>, scalar_prefetch = 0 : i64, scratch_operands = 2 : i64, tpu.core_type = #tpu.core_type<tc>, window_params = [{transform_indices = @transform_0, window_bounds = array<i64: 1, 16, 48>}, {pipeline_mode = #tpu.pipeline_mode<synchronous>, transform_indices = @transform_1, window_bounds = array<i64: 48, 32>}, {pipeline_mode = #tpu.pipeline_mode<synchronous>, transform_indices = @transform_2, window_bounds = array<i64: 1, 32>}, {pipeline_mode = #tpu.pipeline_mode<synchronous>, transform_indices = @transform_3, window_bounds = array<i64: 1, 32>}, {pipeline_mode = #tpu.pipeline_mode<synchronous>, transform_indices = @transform_4, window_bounds = array<i64: 1, 32>}, {pipeline_mode = #tpu.pipeline_mode<synchronous>, transform_indices = @transform_5, window_bounds = array<i64: 32, 32>}, {pipeline_mode = #tpu.pipeline_mode<synchronous>, transform_indices = @transform_6, window_bounds = array<i64: 1, 32>}, {pipeline_mode = #tpu.pipeline_mode<synchronous>, transform_indices = @transform_7, window_bounds = array<i64: 8, 32>}, {pipeline_mode = #tpu.pipeline_mode<synchronous>, transform_indices = @transform_8, window_bounds = array<i64: 8, 32>}, {transform_indices = @transform_9, window_bounds = array<i64: 1, 3, 32, 32>}, {transform_indices = @transform_10, window_bounds = array<i64: 1, 3, 1, 32>}, {transform_indices = @transform_11, window_bounds = array<i64: 1, 32, 32>}, {transform_indices = @transform_12, window_bounds = array<i64: 1, 1, 32>}, {transform_indices = @transform_13, window_bounds = array<i64: 1, 1, 32>}, {transform_indices = @transform_14, window_bounds = array<i64: 1, 1, 32>}, {transform_indices = @transform_15, window_bounds = array<i64: 1, 3, 32, 32>}, {transform_indices = @transform_16, window_bounds = array<i64: 1, 3, 1, 32>}, {transform_indices = @transform_17, window_bounds = array<i64: 1, 32, 32>}, {transform_indices = @transform_18, window_bounds = array<i64: 1, 1, 32>}, {transform_indices = @transform_19, window_bounds = array<i64: 1, 1, 32>}, {transform_indices = @transform_20, window_bounds = array<i64: 1, 1, 32>}, {transform_indices = @transform_21, window_bounds = array<i64: 1, 32, 64>}, {transform_indices = @transform_22, window_bounds = array<i64: 1, 1, 64>}, {transform_indices = @transform_23, window_bounds = array<i64: 1, 64, 32>}, {transform_indices = @transform_24, window_bounds = array<i64: 1, 1, 32>}, {transform_indices = @transform_25, window_bounds = array<i64: 1, 1, 32>}, {transform_indices = @transform_26, window_bounds = array<i64: 1, 1, 32>}, {pipeline_mode = #tpu.pipeline_mode<synchronous>, transform_indices = @transform_27, window_bounds = array<i64: 32, 128>}, {pipeline_mode = #tpu.pipeline_mode<synchronous>, transform_indices = @transform_28, window_bounds = array<i64: 1, 128>}, {pipeline_mode = #tpu.pipeline_mode<synchronous>, transform_indices = @transform_29, window_bounds = array<i64: 32, 32>}, {pipeline_mode = #tpu.pipeline_mode<synchronous>, transform_indices = @transform_30, window_bounds = array<i64: 1, 32>}, {pipeline_mode = #tpu.pipeline_mode<synchronous>, transform_indices = @transform_31, window_bounds = array<i64: 32, 32>}, {pipeline_mode = #tpu.pipeline_mode<synchronous>, transform_indices = @transform_32, window_bounds = array<i64: 1, 32>}, {pipeline_mode = #tpu.pipeline_mode<synchronous>, transform_indices = @transform_33, window_bounds = array<i64: 32, 32>}, {pipeline_mode = #tpu.pipeline_mode<synchronous>, transform_indices = @transform_34, window_bounds = array<i64: 1, 32>}, {transform_indices = @transform_35, window_bounds = array<i64: 1, 8, 128>}, {transform_indices = @transform_36, window_bounds = array<i64: 1, 8, 16>}]} {
    %c0_i32 = arith.constant 0 : i32
    %0 = arith.cmpi eq, %arg1, %c0_i32 : i32
    %1 = arith.extui %0 : i1 to i32
    %c0_i32_0 = arith.constant 0 : i32
    %2 = arith.cmpi ne, %1, %c0_i32_0 : i32
    scf.if %2 {
      %c0_132 = arith.constant 0 : index
      %c0_133 = arith.constant 0 : index
      %c0_134 = arith.constant 0 : index
      %235 = vector.load %arg2[%c0_132, %c0_133, %c0_134] : memref<1x16x48xf32, #tpu.memory_space<vmem>>, vector<1x16x48xf32>
      %236 = vector.shape_cast %235 : vector<1x16x48xf32> to vector<16x48xf32>
      %c0_135 = arith.constant 0 : index
      %c0_136 = arith.constant 0 : index
      %237 = vector.load %arg3[%c0_135, %c0_136] : memref<48x32xf32, #tpu.memory_space<vmem>>, vector<48x32xf32>
      %238 = arith.truncf %236 : vector<16x48xf32> to vector<16x48xbf16>
      %239 = arith.truncf %237 : vector<48x32xf32> to vector<48x32xbf16>
      %cst_137 = arith.constant dense<0.000000e+00> : vector<16x32xf32>
      %240 = tpu.matmul %238, %239, %cst_137 {dimension_numbers = #tpu.dot_dimension_numbers<[1], [0], [0], [1], [0, 0, 1, 1], [], []>} : vector<16x48xbf16>, vector<48x32xbf16>, vector<16x32xf32> -> vector<16x32xf32>
      %c0_138 = arith.constant 0 : index
      %c0_139 = arith.constant 0 : index
      %241 = vector.load %arg4[%c0_138, %c0_139] : memref<1x32xf32, #tpu.memory_space<vmem>>, vector<1x32xf32>
      %242 = vector.broadcast %241 : vector<1x32xf32> to vector<16x32xf32>
      %243 = arith.addf %240, %242 : vector<16x32xf32>
      %c0_140 = arith.constant 0 : index
      %c0_141 = arith.constant 0 : index
      %244 = vector.load %arg5[%c0_140, %c0_141] : memref<1x32xf32, #tpu.memory_space<vmem>>, vector<1x32xf32>
      %c0_142 = arith.constant 0 : index
      %c0_143 = arith.constant 0 : index
      %245 = vector.load %arg6[%c0_142, %c0_143] : memref<1x32xf32, #tpu.memory_space<vmem>>, vector<1x32xf32>
      %cst_144 = arith.constant dense<0.000000e+00> : vector<16xf32>
      %246 = vector.multi_reduction <add>, %243, %cst_144 [1] : vector<16x32xf32> to vector<16xf32>
      %247 = vector.shape_cast %246 : vector<16xf32> to vector<16x1xf32>
      %cst_145 = arith.constant 3.200000e+01 : f32
      %248 = vector.broadcast %cst_145 : f32 to vector<16x1xf32>
      %249 = arith.divf %247, %248 : vector<16x1xf32>
      %250 = vector.broadcast %249 : vector<16x1xf32> to vector<16x32xf32>
      %251 = arith.subf %243, %250 : vector<16x32xf32>
      %252 = arith.mulf %251, %251 : vector<16x32xf32>
      %cst_146 = arith.constant dense<0.000000e+00> : vector<16xf32>
      %253 = vector.multi_reduction <add>, %252, %cst_146 [1] : vector<16x32xf32> to vector<16xf32>
      %254 = vector.shape_cast %253 : vector<16xf32> to vector<16x1xf32>
      %cst_147 = arith.constant 3.200000e+01 : f32
      %255 = vector.broadcast %cst_147 : f32 to vector<16x1xf32>
      %256 = arith.divf %254, %255 : vector<16x1xf32>
      %257 = vector.broadcast %249 : vector<16x1xf32> to vector<16x32xf32>
      %258 = arith.subf %243, %257 : vector<16x32xf32>
      %cst_148 = arith.constant 9.99999974E-6 : f32
      %259 = vector.broadcast %cst_148 : f32 to vector<16x1xf32>
      %260 = arith.addf %256, %259 : vector<16x1xf32>
      %261 = math.rsqrt %260 : vector<16x1xf32>
      %262 = vector.broadcast %261 : vector<16x1xf32> to vector<16x32xf32>
      %263 = arith.mulf %258, %262 : vector<16x32xf32>
      %264 = vector.broadcast %244 : vector<1x32xf32> to vector<16x32xf32>
      %265 = arith.mulf %263, %264 : vector<16x32xf32>
      %266 = vector.broadcast %245 : vector<1x32xf32> to vector<16x32xf32>
      %267 = arith.addf %265, %266 : vector<16x32xf32>
      %c0_149 = arith.constant 0 : index
      %c0_150 = arith.constant 0 : index
      %268 = vector.load %arg7[%c0_149, %c0_150] : memref<32x32xf32, #tpu.memory_space<vmem>>, vector<32x32xf32>
      %269 = arith.truncf %267 : vector<16x32xf32> to vector<16x32xbf16>
      %270 = arith.truncf %268 : vector<32x32xf32> to vector<32x32xbf16>
      %cst_151 = arith.constant dense<0.000000e+00> : vector<16x32xf32>
      %271 = tpu.matmul %269, %270, %cst_151 {dimension_numbers = #tpu.dot_dimension_numbers<[1], [0], [0], [1], [0, 0, 1, 1], [], []>} : vector<16x32xbf16>, vector<32x32xbf16>, vector<16x32xf32> -> vector<16x32xf32>
      %c0_152 = arith.constant 0 : index
      %c0_153 = arith.constant 0 : index
      %272 = vector.load %arg8[%c0_152, %c0_153] : memref<1x32xf32, #tpu.memory_space<vmem>>, vector<1x32xf32>
      %273 = vector.broadcast %272 : vector<1x32xf32> to vector<16x32xf32>
      %274 = arith.addf %271, %273 : vector<16x32xf32>
      %275 = arith.mulf %274, %274 : vector<16x32xf32>
      %276 = arith.mulf %274, %275 : vector<16x32xf32>
      %cst_154 = arith.constant 4.471500e-02 : f32
      %277 = vector.broadcast %cst_154 : f32 to vector<16x32xf32>
      %278 = arith.mulf %277, %276 : vector<16x32xf32>
      %279 = arith.addf %274, %278 : vector<16x32xf32>
      %cst_155 = arith.constant 0.797884583 : f32
      %280 = vector.broadcast %cst_155 : f32 to vector<16x32xf32>
      %281 = arith.mulf %280, %279 : vector<16x32xf32>
      %282 = math.tanh %281 : vector<16x32xf32>
      %cst_156 = arith.constant 1.000000e+00 : f32
      %283 = vector.broadcast %cst_156 : f32 to vector<16x32xf32>
      %284 = arith.addf %283, %282 : vector<16x32xf32>
      %cst_157 = arith.constant 5.000000e-01 : f32
      %285 = vector.broadcast %cst_157 : f32 to vector<16x32xf32>
      %286 = arith.mulf %285, %284 : vector<16x32xf32>
      %287 = arith.mulf %274, %286 : vector<16x32xf32>
      %288 = arith.truncf %287 : vector<16x32xf32> to vector<16x32xbf16>
      %c0_158 = arith.constant 0 : index
      %c0_159 = arith.constant 0 : index
      %289 = vector.load %arg40[%c0_158, %c0_159] : memref<16x32xbf16, #tpu.memory_space<vmem>>, vector<16x32xbf16>
      tpu.vector_store %arg40[%c0_158, %c0_159], %288 {strides = array<i32>} : memref<16x32xbf16, #tpu.memory_space<vmem>>, vector<16x32xbf16>,
      %c0_160 = arith.constant 0 : index
      %c0_161 = arith.constant 0 : index
      %290 = vector.load %arg9[%c0_160, %c0_161] : memref<8x32xf32, #tpu.memory_space<vmem>>, vector<8x32xf32>
      %c0_162 = arith.constant 0 : index
      %c0_163 = arith.constant 0 : index
      %291 = vector.load %arg39[%c0_162, %c0_163] : memref<8x32xf32, #tpu.memory_space<vmem>>, vector<8x32xf32>
      tpu.vector_store %arg39[%c0_162, %c0_163], %290 {strides = array<i32>} : memref<8x32xf32, #tpu.memory_space<vmem>>, vector<8x32xf32>,
    } else {
    }
    %c0 = arith.constant 0 : index
    %c0_1 = arith.constant 0 : index
    %3 = vector.load %arg39[%c0, %c0_1] : memref<8x32xf32, #tpu.memory_space<vmem>>, vector<8x32xf32>
    %c0_2 = arith.constant 0 : index
    %c0_3 = arith.constant 0 : index
    %4 = vector.load %arg10[%c0_2, %c0_3] : memref<8x32xf32, #tpu.memory_space<vmem>>, vector<8x32xf32>
    %c0_4 = arith.constant 0 : index
    %c0_5 = arith.constant 0 : index
    %5 = vector.load %arg40[%c0_4, %c0_5] : memref<16x32xbf16, #tpu.memory_space<vmem>>, vector<16x32xbf16>
    %6 = arith.addf %3, %4 : vector<8x32xf32>
    %c0_6 = arith.constant 0 : index
    %c0_7 = arith.constant 0 : index
    %c0_8 = arith.constant 0 : index
    %c0_9 = arith.constant 0 : index
    %7 = vector.load %arg11[%c0_6, %c0_7, %c0_8, %c0_9] : memref<1x3x32x32xf32, #tpu.memory_space<vmem>>, vector<1x1x32x32xf32>
    %8 = vector.shape_cast %7 : vector<1x1x32x32xf32> to vector<32x32xf32>
    %9 = arith.truncf %6 : vector<8x32xf32> to vector<8x32xbf16>
    %10 = arith.truncf %8 : vector<32x32xf32> to vector<32x32xbf16>
    %cst = arith.constant dense<0.000000e+00> : vector<8x32xf32>
    %11 = tpu.matmul %9, %10, %cst {dimension_numbers = #tpu.dot_dimension_numbers<[1], [0], [0], [1], [0, 0, 1, 1], [], []>} : vector<8x32xbf16>, vector<32x32xbf16>, vector<8x32xf32> -> vector<8x32xf32>
    %c0_10 = arith.constant 0 : index
    %c0_11 = arith.constant 0 : index
    %c0_12 = arith.constant 0 : index
    %c0_13 = arith.constant 0 : index
    %12 = vector.load %arg12[%c0_10, %c0_11, %c0_12, %c0_13] : memref<1x3x1x32xf32, #tpu.memory_space<vmem>>, vector<1x1x1x32xf32>
    %13 = vector.shape_cast %12 : vector<1x1x1x32xf32> to vector<1x32xf32>
    %14 = vector.broadcast %13 : vector<1x32xf32> to vector<8x32xf32>
    %15 = arith.addf %11, %14 : vector<8x32xf32>
    %c0_14 = arith.constant 0 : index
    %c1 = arith.constant 1 : index
    %c0_15 = arith.constant 0 : index
    %c0_16 = arith.constant 0 : index
    %16 = vector.load %arg11[%c0_14, %c1, %c0_15, %c0_16] : memref<1x3x32x32xf32, #tpu.memory_space<vmem>>, vector<1x1x32x32xf32>
    %17 = vector.shape_cast %16 : vector<1x1x32x32xf32> to vector<32x32xf32>
    %18 = arith.truncf %17 : vector<32x32xf32> to vector<32x32xbf16>
    %cst_17 = arith.constant dense<0.000000e+00> : vector<16x32xf32>
    %19 = tpu.matmul %5, %18, %cst_17 {dimension_numbers = #tpu.dot_dimension_numbers<[1], [0], [0], [1], [0, 0, 1, 1], [], []>} : vector<16x32xbf16>, vector<32x32xbf16>, vector<16x32xf32> -> vector<16x32xf32>
    %c0_18 = arith.constant 0 : index
    %c1_19 = arith.constant 1 : index
    %c0_20 = arith.constant 0 : index
    %c0_21 = arith.constant 0 : index
    %20 = vector.load %arg12[%c0_18, %c1_19, %c0_20, %c0_21] : memref<1x3x1x32xf32, #tpu.memory_space<vmem>>, vector<1x1x1x32xf32>
    %21 = vector.shape_cast %20 : vector<1x1x1x32xf32> to vector<1x32xf32>
    %22 = vector.broadcast %21 : vector<1x32xf32> to vector<16x32xf32>
    %23 = arith.addf %19, %22 : vector<16x32xf32>
    %c0_22 = arith.constant 0 : index
    %c2 = arith.constant 2 : index
    %c0_23 = arith.constant 0 : index
    %c0_24 = arith.constant 0 : index
    %24 = vector.load %arg11[%c0_22, %c2, %c0_23, %c0_24] : memref<1x3x32x32xf32, #tpu.memory_space<vmem>>, vector<1x1x32x32xf32>
    %25 = vector.shape_cast %24 : vector<1x1x32x32xf32> to vector<32x32xf32>
    %26 = arith.truncf %25 : vector<32x32xf32> to vector<32x32xbf16>
    %cst_25 = arith.constant dense<0.000000e+00> : vector<16x32xf32>
    %27 = tpu.matmul %5, %26, %cst_25 {dimension_numbers = #tpu.dot_dimension_numbers<[1], [0], [0], [1], [0, 0, 1, 1], [], []>} : vector<16x32xbf16>, vector<32x32xbf16>, vector<16x32xf32> -> vector<16x32xf32>
    %c0_26 = arith.constant 0 : index
    %c2_27 = arith.constant 2 : index
    %c0_28 = arith.constant 0 : index
    %c0_29 = arith.constant 0 : index
    %28 = vector.load %arg12[%c0_26, %c2_27, %c0_28, %c0_29] : memref<1x3x1x32xf32, #tpu.memory_space<vmem>>, vector<1x1x1x32xf32>
    %29 = vector.shape_cast %28 : vector<1x1x1x32xf32> to vector<1x32xf32>
    %30 = vector.broadcast %29 : vector<1x32xf32> to vector<16x32xf32>
    %31 = arith.addf %27, %30 : vector<16x32xf32>
    %cst_30 = arith.constant 2.500000e-01 : f32
    %32 = vector.broadcast %cst_30 : f32 to vector<8x32xf32>
    %33 = arith.mulf %15, %32 : vector<8x32xf32>
    %34 = vector.shape_cast %33 : vector<8x32xf32> to vector<8x2x16xf32>
    %35 = tpu.transpose %34, [1, 0, 2] : vector<8x2x16xf32> -> vector<2x8x16xf32>
    %36 = vector.shape_cast %23 : vector<16x32xf32> to vector<16x2x16xf32>
    %37 = tpu.transpose %36, [1, 0, 2] : vector<16x2x16xf32> -> vector<2x16x16xf32>
    %38 = vector.shape_cast %31 : vector<16x32xf32> to vector<16x2x16xf32>
    %39 = tpu.transpose %38, [1, 0, 2] : vector<16x2x16xf32> -> vector<2x16x16xf32>
    %40 = arith.truncf %35 : vector<2x8x16xf32> to vector<2x8x16xbf16>
    %41 = arith.truncf %37 : vector<2x16x16xf32> to vector<2x16x16xbf16>
    %cst_31 = arith.constant dense<0.000000e+00> : vector<2x8x16xf32>
    %42 = tpu.matmul %40, %41, %cst_31 {dimension_numbers = #tpu.dot_dimension_numbers<[2], [2], [1], [1], [0, 0, 0, 1, 1, 1], [0], [0]>} : vector<2x8x16xbf16>, vector<2x16x16xbf16>, vector<2x8x16xf32> -> vector<2x8x16xf32>
    %cst_32 = arith.constant dense<0xFF800000> : vector<2x8xf32>
    %43 = vector.multi_reduction <maximumf>, %42, %cst_32 [2] : vector<2x8x16xf32> to vector<2x8xf32>
    %44 = vector.shape_cast %43 : vector<2x8xf32> to vector<2x8x1xf32>
    %45 = vector.broadcast %44 : vector<2x8x1xf32> to vector<2x8x16xf32>
    %46 = arith.subf %42, %45 : vector<2x8x16xf32>
    %47 = math.exp %46 : vector<2x8x16xf32>
    %cst_33 = arith.constant dense<0.000000e+00> : vector<2x8xf32>
    %48 = vector.multi_reduction <add>, %47, %cst_33 [2] : vector<2x8x16xf32> to vector<2x8xf32>
    %49 = vector.shape_cast %48 : vector<2x8xf32> to vector<2x8x1xf32>
    %50 = tpu.reciprocal %49 {approx = true} : vector<2x8x1xf32> -> vector<2x8x1xf32>
    %51 = vector.broadcast %50 : vector<2x8x1xf32> to vector<2x8x16xf32>
    %52 = arith.mulf %47, %51 : vector<2x8x16xf32>
    %53 = arith.truncf %52 : vector<2x8x16xf32> to vector<2x8x16xbf16>
    %54 = arith.truncf %39 : vector<2x16x16xf32> to vector<2x16x16xbf16>
    %cst_34 = arith.constant dense<0.000000e+00> : vector<2x8x16xf32>
    %55 = tpu.matmul %53, %54, %cst_34 {dimension_numbers = #tpu.dot_dimension_numbers<[2], [1], [1], [2], [0, 0, 0, 1, 1, 2], [0], [0]>} : vector<2x8x16xbf16>, vector<2x16x16xbf16>, vector<2x8x16xf32> -> vector<2x8x16xf32>
    %56 = tpu.transpose %55, [1, 0, 2] : vector<2x8x16xf32> -> vector<8x2x16xf32>
    %57 = vector.shape_cast %56 : vector<8x2x16xf32> to vector<8x32xf32>
    %c0_35 = arith.constant 0 : index
    %c0_36 = arith.constant 0 : index
    %c0_37 = arith.constant 0 : index
    %58 = vector.load %arg13[%c0_35, %c0_36, %c0_37] : memref<1x32x32xf32, #tpu.memory_space<vmem>>, vector<1x32x32xf32>
    %59 = vector.shape_cast %58 : vector<1x32x32xf32> to vector<32x32xf32>
    %60 = arith.truncf %57 : vector<8x32xf32> to vector<8x32xbf16>
    %61 = arith.truncf %59 : vector<32x32xf32> to vector<32x32xbf16>
    %cst_38 = arith.constant dense<0.000000e+00> : vector<8x32xf32>
    %62 = tpu.matmul %60, %61, %cst_38 {dimension_numbers = #tpu.dot_dimension_numbers<[1], [0], [0], [1], [0, 0, 1, 1], [], []>} : vector<8x32xbf16>, vector<32x32xbf16>, vector<8x32xf32> -> vector<8x32xf32>
    %c0_39 = arith.constant 0 : index
    %c0_40 = arith.constant 0 : index
    %c0_41 = arith.constant 0 : index
    %63 = vector.load %arg14[%c0_39, %c0_40, %c0_41] : memref<1x1x32xf32, #tpu.memory_space<vmem>>, vector<1x1x32xf32>
    %64 = vector.shape_cast %63 : vector<1x1x32xf32> to vector<1x32xf32>
    %65 = vector.broadcast %64 : vector<1x32xf32> to vector<8x32xf32>
    %66 = arith.addf %62, %65 : vector<8x32xf32>
    %67 = arith.addf %3, %66 : vector<8x32xf32>
    %c0_42 = arith.constant 0 : index
    %c0_43 = arith.constant 0 : index
    %c0_44 = arith.constant 0 : index
    %68 = vector.load %arg15[%c0_42, %c0_43, %c0_44] : memref<1x1x32xf32, #tpu.memory_space<vmem>>, vector<1x1x32xf32>
    %69 = vector.shape_cast %68 : vector<1x1x32xf32> to vector<1x32xf32>
    %c0_45 = arith.constant 0 : index
    %c0_46 = arith.constant 0 : index
    %c0_47 = arith.constant 0 : index
    %70 = vector.load %arg16[%c0_45, %c0_46, %c0_47] : memref<1x1x32xf32, #tpu.memory_space<vmem>>, vector<1x1x32xf32>
    %71 = vector.shape_cast %70 : vector<1x1x32xf32> to vector<1x32xf32>
    %cst_48 = arith.constant dense<0.000000e+00> : vector<8xf32>
    %72 = vector.multi_reduction <add>, %67, %cst_48 [1] : vector<8x32xf32> to vector<8xf32>
    %73 = vector.shape_cast %72 : vector<8xf32> to vector<8x1xf32>
    %cst_49 = arith.constant 3.200000e+01 : f32
    %74 = vector.broadcast %cst_49 : f32 to vector<8x1xf32>
    %75 = arith.divf %73, %74 : vector<8x1xf32>
    %76 = vector.broadcast %75 : vector<8x1xf32> to vector<8x32xf32>
    %77 = arith.subf %67, %76 : vector<8x32xf32>
    %78 = arith.mulf %77, %77 : vector<8x32xf32>
    %cst_50 = arith.constant dense<0.000000e+00> : vector<8xf32>
    %79 = vector.multi_reduction <add>, %78, %cst_50 [1] : vector<8x32xf32> to vector<8xf32>
    %80 = vector.shape_cast %79 : vector<8xf32> to vector<8x1xf32>
    %cst_51 = arith.constant 3.200000e+01 : f32
    %81 = vector.broadcast %cst_51 : f32 to vector<8x1xf32>
    %82 = arith.divf %80, %81 : vector<8x1xf32>
    %83 = vector.broadcast %75 : vector<8x1xf32> to vector<8x32xf32>
    %84 = arith.subf %67, %83 : vector<8x32xf32>
    %cst_52 = arith.constant 9.99999974E-6 : f32
    %85 = vector.broadcast %cst_52 : f32 to vector<8x1xf32>
    %86 = arith.addf %82, %85 : vector<8x1xf32>
    %87 = math.rsqrt %86 : vector<8x1xf32>
    %88 = vector.broadcast %87 : vector<8x1xf32> to vector<8x32xf32>
    %89 = arith.mulf %84, %88 : vector<8x32xf32>
    %90 = vector.broadcast %69 : vector<1x32xf32> to vector<8x32xf32>
    %91 = arith.mulf %89, %90 : vector<8x32xf32>
    %92 = vector.broadcast %71 : vector<1x32xf32> to vector<8x32xf32>
    %93 = arith.addf %91, %92 : vector<8x32xf32>
    %94 = arith.addf %93, %4 : vector<8x32xf32>
    %c0_53 = arith.constant 0 : index
    %c0_54 = arith.constant 0 : index
    %c0_55 = arith.constant 0 : index
    %c0_56 = arith.constant 0 : index
    %95 = vector.load %arg17[%c0_53, %c0_54, %c0_55, %c0_56] : memref<1x3x32x32xf32, #tpu.memory_space<vmem>>, vector<1x1x32x32xf32>
    %96 = vector.shape_cast %95 : vector<1x1x32x32xf32> to vector<32x32xf32>
    %97 = arith.truncf %94 : vector<8x32xf32> to vector<8x32xbf16>
    %98 = arith.truncf %96 : vector<32x32xf32> to vector<32x32xbf16>
    %cst_57 = arith.constant dense<0.000000e+00> : vector<8x32xf32>
    %99 = tpu.matmul %97, %98, %cst_57 {dimension_numbers = #tpu.dot_dimension_numbers<[1], [0], [0], [1], [0, 0, 1, 1], [], []>} : vector<8x32xbf16>, vector<32x32xbf16>, vector<8x32xf32> -> vector<8x32xf32>
    %c0_58 = arith.constant 0 : index
    %c0_59 = arith.constant 0 : index
    %c0_60 = arith.constant 0 : index
    %c0_61 = arith.constant 0 : index
    %100 = vector.load %arg18[%c0_58, %c0_59, %c0_60, %c0_61] : memref<1x3x1x32xf32, #tpu.memory_space<vmem>>, vector<1x1x1x32xf32>
    %101 = vector.shape_cast %100 : vector<1x1x1x32xf32> to vector<1x32xf32>
    %102 = vector.broadcast %101 : vector<1x32xf32> to vector<8x32xf32>
    %103 = arith.addf %99, %102 : vector<8x32xf32>
    %c0_62 = arith.constant 0 : index
    %c1_63 = arith.constant 1 : index
    %c0_64 = arith.constant 0 : index
    %c0_65 = arith.constant 0 : index
    %104 = vector.load %arg17[%c0_62, %c1_63, %c0_64, %c0_65] : memref<1x3x32x32xf32, #tpu.memory_space<vmem>>, vector<1x1x32x32xf32>
    %105 = vector.shape_cast %104 : vector<1x1x32x32xf32> to vector<32x32xf32>
    %106 = arith.truncf %94 : vector<8x32xf32> to vector<8x32xbf16>
    %107 = arith.truncf %105 : vector<32x32xf32> to vector<32x32xbf16>
    %cst_66 = arith.constant dense<0.000000e+00> : vector<8x32xf32>
    %108 = tpu.matmul %106, %107, %cst_66 {dimension_numbers = #tpu.dot_dimension_numbers<[1], [0], [0], [1], [0, 0, 1, 1], [], []>} : vector<8x32xbf16>, vector<32x32xbf16>, vector<8x32xf32> -> vector<8x32xf32>
    %c0_67 = arith.constant 0 : index
    %c1_68 = arith.constant 1 : index
    %c0_69 = arith.constant 0 : index
    %c0_70 = arith.constant 0 : index
    %109 = vector.load %arg18[%c0_67, %c1_68, %c0_69, %c0_70] : memref<1x3x1x32xf32, #tpu.memory_space<vmem>>, vector<1x1x1x32xf32>
    %110 = vector.shape_cast %109 : vector<1x1x1x32xf32> to vector<1x32xf32>
    %111 = vector.broadcast %110 : vector<1x32xf32> to vector<8x32xf32>
    %112 = arith.addf %108, %111 : vector<8x32xf32>
    %c0_71 = arith.constant 0 : index
    %c2_72 = arith.constant 2 : index
    %c0_73 = arith.constant 0 : index
    %c0_74 = arith.constant 0 : index
    %113 = vector.load %arg17[%c0_71, %c2_72, %c0_73, %c0_74] : memref<1x3x32x32xf32, #tpu.memory_space<vmem>>, vector<1x1x32x32xf32>
    %114 = vector.shape_cast %113 : vector<1x1x32x32xf32> to vector<32x32xf32>
    %115 = arith.truncf %93 : vector<8x32xf32> to vector<8x32xbf16>
    %116 = arith.truncf %114 : vector<32x32xf32> to vector<32x32xbf16>
    %cst_75 = arith.constant dense<0.000000e+00> : vector<8x32xf32>
    %117 = tpu.matmul %115, %116, %cst_75 {dimension_numbers = #tpu.dot_dimension_numbers<[1], [0], [0], [1], [0, 0, 1, 1], [], []>} : vector<8x32xbf16>, vector<32x32xbf16>, vector<8x32xf32> -> vector<8x32xf32>
    %c0_76 = arith.constant 0 : index
    %c2_77 = arith.constant 2 : index
    %c0_78 = arith.constant 0 : index
    %c0_79 = arith.constant 0 : index
    %118 = vector.load %arg18[%c0_76, %c2_77, %c0_78, %c0_79] : memref<1x3x1x32xf32, #tpu.memory_space<vmem>>, vector<1x1x1x32xf32>
    %119 = vector.shape_cast %118 : vector<1x1x1x32xf32> to vector<1x32xf32>
    %120 = vector.broadcast %119 : vector<1x32xf32> to vector<8x32xf32>
    %121 = arith.addf %117, %120 : vector<8x32xf32>
    %cst_80 = arith.constant 2.500000e-01 : f32
    %122 = vector.broadcast %cst_80 : f32 to vector<8x32xf32>
    %123 = arith.mulf %103, %122 : vector<8x32xf32>
    %124 = vector.shape_cast %123 : vector<8x32xf32> to vector<8x2x16xf32>
    %125 = tpu.transpose %124, [1, 0, 2] : vector<8x2x16xf32> -> vector<2x8x16xf32>
    %126 = vector.shape_cast %112 : vector<8x32xf32> to vector<8x2x16xf32>
    %127 = tpu.transpose %126, [1, 0, 2] : vector<8x2x16xf32> -> vector<2x8x16xf32>
    %128 = vector.shape_cast %121 : vector<8x32xf32> to vector<8x2x16xf32>
    %129 = tpu.transpose %128, [1, 0, 2] : vector<8x2x16xf32> -> vector<2x8x16xf32>
    %130 = arith.truncf %125 : vector<2x8x16xf32> to vector<2x8x16xbf16>
    %131 = arith.truncf %127 : vector<2x8x16xf32> to vector<2x8x16xbf16>
    %cst_81 = arith.constant dense<0.000000e+00> : vector<2x8x8xf32>
    %132 = tpu.matmul %130, %131, %cst_81 {dimension_numbers = #tpu.dot_dimension_numbers<[2], [2], [1], [1], [0, 0, 0, 1, 1, 1], [0], [0]>} : vector<2x8x16xbf16>, vector<2x8x16xbf16>, vector<2x8x8xf32> -> vector<2x8x8xf32>
    %cst_82 = arith.constant dense<0xFF800000> : vector<2x8xf32>
    %133 = vector.multi_reduction <maximumf>, %132, %cst_82 [2] : vector<2x8x8xf32> to vector<2x8xf32>
    %134 = vector.shape_cast %133 : vector<2x8xf32> to vector<2x8x1xf32>
    %135 = vector.broadcast %134 : vector<2x8x1xf32> to vector<2x8x8xf32>
    %136 = arith.subf %132, %135 : vector<2x8x8xf32>
    %137 = math.exp %136 : vector<2x8x8xf32>
    %cst_83 = arith.constant dense<0.000000e+00> : vector<2x8xf32>
    %138 = vector.multi_reduction <add>, %137, %cst_83 [2] : vector<2x8x8xf32> to vector<2x8xf32>
    %139 = vector.shape_cast %138 : vector<2x8xf32> to vector<2x8x1xf32>
    %140 = tpu.reciprocal %139 {approx = true} : vector<2x8x1xf32> -> vector<2x8x1xf32>
    %141 = vector.broadcast %140 : vector<2x8x1xf32> to vector<2x8x8xf32>
    %142 = arith.mulf %137, %141 : vector<2x8x8xf32>
    %143 = arith.truncf %142 : vector<2x8x8xf32> to vector<2x8x8xbf16>
    %144 = arith.truncf %129 : vector<2x8x16xf32> to vector<2x8x16xbf16>
    %cst_84 = arith.constant dense<0.000000e+00> : vector<2x8x16xf32>
    %145 = tpu.matmul %143, %144, %cst_84 {dimension_numbers = #tpu.dot_dimension_numbers<[2], [1], [1], [2], [0, 0, 0, 1, 1, 2], [0], [0]>} : vector<2x8x8xbf16>, vector<2x8x16xbf16>, vector<2x8x16xf32> -> vector<2x8x16xf32>
    %146 = tpu.transpose %145, [1, 0, 2] : vector<2x8x16xf32> -> vector<8x2x16xf32>
    %147 = vector.shape_cast %146 : vector<8x2x16xf32> to vector<8x32xf32>
    %c0_85 = arith.constant 0 : index
    %c0_86 = arith.constant 0 : index
    %c0_87 = arith.constant 0 : index
    %148 = vector.load %arg19[%c0_85, %c0_86, %c0_87] : memref<1x32x32xf32, #tpu.memory_space<vmem>>, vector<1x32x32xf32>
    %149 = vector.shape_cast %148 : vector<1x32x32xf32> to vector<32x32xf32>
    %150 = arith.truncf %147 : vector<8x32xf32> to vector<8x32xbf16>
    %151 = arith.truncf %149 : vector<32x32xf32> to vector<32x32xbf16>
    %cst_88 = arith.constant dense<0.000000e+00> : vector<8x32xf32>
    %152 = tpu.matmul %150, %151, %cst_88 {dimension_numbers = #tpu.dot_dimension_numbers<[1], [0], [0], [1], [0, 0, 1, 1], [], []>} : vector<8x32xbf16>, vector<32x32xbf16>, vector<8x32xf32> -> vector<8x32xf32>
    %c0_89 = arith.constant 0 : index
    %c0_90 = arith.constant 0 : index
    %c0_91 = arith.constant 0 : index
    %153 = vector.load %arg20[%c0_89, %c0_90, %c0_91] : memref<1x1x32xf32, #tpu.memory_space<vmem>>, vector<1x1x32xf32>
    %154 = vector.shape_cast %153 : vector<1x1x32xf32> to vector<1x32xf32>
    %155 = vector.broadcast %154 : vector<1x32xf32> to vector<8x32xf32>
    %156 = arith.addf %152, %155 : vector<8x32xf32>
    %157 = arith.addf %93, %156 : vector<8x32xf32>
    %c0_92 = arith.constant 0 : index
    %c0_93 = arith.constant 0 : index
    %c0_94 = arith.constant 0 : index
    %158 = vector.load %arg21[%c0_92, %c0_93, %c0_94] : memref<1x1x32xf32, #tpu.memory_space<vmem>>, vector<1x1x32xf32>
    %159 = vector.shape_cast %158 : vector<1x1x32xf32> to vector<1x32xf32>
    %c0_95 = arith.constant 0 : index
    %c0_96 = arith.constant 0 : index
    %c0_97 = arith.constant 0 : index
    %160 = vector.load %arg22[%c0_95, %c0_96, %c0_97] : memref<1x1x32xf32, #tpu.memory_space<vmem>>, vector<1x1x32xf32>
    %161 = vector.shape_cast %160 : vector<1x1x32xf32> to vector<1x32xf32>
    %cst_98 = arith.constant dense<0.000000e+00> : vector<8xf32>
    %162 = vector.multi_reduction <add>, %157, %cst_98 [1] : vector<8x32xf32> to vector<8xf32>
    %163 = vector.shape_cast %162 : vector<8xf32> to vector<8x1xf32>
    %cst_99 = arith.constant 3.200000e+01 : f32
    %164 = vector.broadcast %cst_99 : f32 to vector<8x1xf32>
    %165 = arith.divf %163, %164 : vector<8x1xf32>
    %166 = vector.broadcast %165 : vector<8x1xf32> to vector<8x32xf32>
    %167 = arith.subf %157, %166 : vector<8x32xf32>
    %168 = arith.mulf %167, %167 : vector<8x32xf32>
    %cst_100 = arith.constant dense<0.000000e+00> : vector<8xf32>
    %169 = vector.multi_reduction <add>, %168, %cst_100 [1] : vector<8x32xf32> to vector<8xf32>
    %170 = vector.shape_cast %169 : vector<8xf32> to vector<8x1xf32>
    %cst_101 = arith.constant 3.200000e+01 : f32
    %171 = vector.broadcast %cst_101 : f32 to vector<8x1xf32>
    %172 = arith.divf %170, %171 : vector<8x1xf32>
    %173 = vector.broadcast %165 : vector<8x1xf32> to vector<8x32xf32>
    %174 = arith.subf %157, %173 : vector<8x32xf32>
    %cst_102 = arith.constant 9.99999974E-6 : f32
    %175 = vector.broadcast %cst_102 : f32 to vector<8x1xf32>
    %176 = arith.addf %172, %175 : vector<8x1xf32>
    %177 = math.rsqrt %176 : vector<8x1xf32>
    %178 = vector.broadcast %177 : vector<8x1xf32> to vector<8x32xf32>
    %179 = arith.mulf %174, %178 : vector<8x32xf32>
    %180 = vector.broadcast %159 : vector<1x32xf32> to vector<8x32xf32>
    %181 = arith.mulf %179, %180 : vector<8x32xf32>
    %182 = vector.broadcast %161 : vector<1x32xf32> to vector<8x32xf32>
    %183 = arith.addf %181, %182 : vector<8x32xf32>
    %c0_103 = arith.constant 0 : index
    %c0_104 = arith.constant 0 : index
    %c0_105 = arith.constant 0 : index
    %184 = vector.load %arg23[%c0_103, %c0_104, %c0_105] : memref<1x32x64xf32, #tpu.memory_space<vmem>>, vector<1x32x64xf32>
    %185 = vector.shape_cast %184 : vector<1x32x64xf32> to vector<32x64xf32>
    %186 = arith.truncf %183 : vector<8x32xf32> to vector<8x32xbf16>
    %187 = arith.truncf %185 : vector<32x64xf32> to vector<32x64xbf16>
    %cst_106 = arith.constant dense<0.000000e+00> : vector<8x64xf32>
    %188 = tpu.matmul %186, %187, %cst_106 {dimension_numbers = #tpu.dot_dimension_numbers<[1], [0], [0], [1], [0, 0, 1, 1], [], []>} : vector<8x32xbf16>, vector<32x64xbf16>, vector<8x64xf32> -> vector<8x64xf32>
    %c0_107 = arith.constant 0 : index
    %c0_108 = arith.constant 0 : index
    %c0_109 = arith.constant 0 : index
    %189 = vector.load %arg24[%c0_107, %c0_108, %c0_109] : memref<1x1x64xf32, #tpu.memory_space<vmem>>, vector<1x1x64xf32>
    %190 = vector.shape_cast %189 : vector<1x1x64xf32> to vector<1x64xf32>
    %191 = vector.broadcast %190 : vector<1x64xf32> to vector<8x64xf32>
    %192 = arith.addf %188, %191 : vector<8x64xf32>
    %cst_110 = arith.constant 0.000000e+00 : f32
    %193 = vector.broadcast %cst_110 : f32 to vector<8x64xf32>
    %194 = arith.maximumf %192, %193 : vector<8x64xf32>
    %c0_111 = arith.constant 0 : index
    %c0_112 = arith.constant 0 : index
    %c0_113 = arith.constant 0 : index
    %195 = vector.load %arg25[%c0_111, %c0_112, %c0_113] : memref<1x64x32xf32, #tpu.memory_space<vmem>>, vector<1x64x32xf32>
    %196 = vector.shape_cast %195 : vector<1x64x32xf32> to vector<64x32xf32>
    %197 = arith.truncf %194 : vector<8x64xf32> to vector<8x64xbf16>
    %198 = arith.truncf %196 : vector<64x32xf32> to vector<64x32xbf16>
    %cst_114 = arith.constant dense<0.000000e+00> : vector<8x32xf32>
    %199 = tpu.matmul %197, %198, %cst_114 {dimension_numbers = #tpu.dot_dimension_numbers<[1], [0], [0], [1], [0, 0, 1, 1], [], []>} : vector<8x64xbf16>, vector<64x32xbf16>, vector<8x32xf32> -> vector<8x32xf32>
    %c0_115 = arith.constant 0 : index
    %c0_116 = arith.constant 0 : index
    %c0_117 = arith.constant 0 : index
    %200 = vector.load %arg26[%c0_115, %c0_116, %c0_117] : memref<1x1x32xf32, #tpu.memory_space<vmem>>, vector<1x1x32xf32>
    %201 = vector.shape_cast %200 : vector<1x1x32xf32> to vector<1x32xf32>
    %202 = vector.broadcast %201 : vector<1x32xf32> to vector<8x32xf32>
    %203 = arith.addf %199, %202 : vector<8x32xf32>
    %204 = arith.addf %183, %203 : vector<8x32xf32>
    %c0_118 = arith.constant 0 : index
    %c0_119 = arith.constant 0 : index
    %c0_120 = arith.constant 0 : index
    %205 = vector.load %arg27[%c0_118, %c0_119, %c0_120] : memref<1x1x32xf32, #tpu.memory_space<vmem>>, vector<1x1x32xf32>
    %206 = vector.shape_cast %205 : vector<1x1x32xf32> to vector<1x32xf32>
    %c0_121 = arith.constant 0 : index
    %c0_122 = arith.constant 0 : index
    %c0_123 = arith.constant 0 : index
    %207 = vector.load %arg28[%c0_121, %c0_122, %c0_123] : memref<1x1x32xf32, #tpu.memory_space<vmem>>, vector<1x1x32xf32>
    %208 = vector.shape_cast %207 : vector<1x1x32xf32> to vector<1x32xf32>
    %cst_124 = arith.constant dense<0.000000e+00> : vector<8xf32>
    %209 = vector.multi_reduction <add>, %204, %cst_124 [1] : vector<8x32xf32> to vector<8xf32>
    %210 = vector.shape_cast %209 : vector<8xf32> to vector<8x1xf32>
    %cst_125 = arith.constant 3.200000e+01 : f32
    %211 = vector.broadcast %cst_125 : f32 to vector<8x1xf32>
    %212 = arith.divf %210, %211 : vector<8x1xf32>
    %213 = vector.broadcast %212 : vector<8x1xf32> to vector<8x32xf32>
    %214 = arith.subf %204, %213 : vector<8x32xf32>
    %215 = arith.mulf %214, %214 : vector<8x32xf32>
    %cst_126 = arith.constant dense<0.000000e+00> : vector<8xf32>
    %216 = vector.multi_reduction <add>, %215, %cst_126 [1] : vector<8x32xf32> to vector<8xf32>
    %217 = vector.shape_cast %216 : vector<8xf32> to vector<8x1xf32>
    %cst_127 = arith.constant 3.200000e+01 : f32
    %218 = vector.broadcast %cst_127 : f32 to vector<8x1xf32>
    %219 = arith.divf %217, %218 : vector<8x1xf32>
    %220 = vector.broadcast %212 : vector<8x1xf32> to vector<8x32xf32>
    %221 = arith.subf %204, %220 : vector<8x32xf32>
    %cst_128 = arith.constant 9.99999974E-6 : f32
    %222 = vector.broadcast %cst_128 : f32 to vector<8x1xf32>
    %223 = arith.addf %219, %222 : vector<8x1xf32>
    %224 = math.rsqrt %223 : vector<8x1xf32>
    %225 = vector.broadcast %224 : vector<8x1xf32> to vector<8x32xf32>
    %226 = arith.mulf %221, %225 : vector<8x32xf32>
    %227 = vector.broadcast %206 : vector<1x32xf32> to vector<8x32xf32>
    %228 = arith.mulf %226, %227 : vector<8x32xf32>
    %229 = vector.broadcast %208 : vector<1x32xf32> to vector<8x32xf32>
    %230 = arith.addf %228, %229 : vector<8x32xf32>
    %c0_129 = arith.constant 0 : index
    %c0_130 = arith.constant 0 : index
    %231 = vector.load %arg39[%c0_129, %c0_130] : memref<8x32xf32, #tpu.memory_space<vmem>>, vector<8x32xf32>
    tpu.vector_store %arg39[%c0_129, %c0_130], %230 {strides = array<i32>} : memref<8x32xf32, #tpu.memory_space<vmem>>, vector<8x32xf32>,
    %c1_i32 = arith.constant 1 : i32
    %232 = arith.cmpi eq, %arg1, %c1_i32 : i32
    %233 = arith.extui %232 : i1 to i32
    %c0_i32_131 = arith.constant 0 : i32
    %234 = arith.cmpi ne, %233, %c0_i32_131 : i32
    scf.if %234 {
      %c0_132 = arith.constant 0 : index
      %c0_133 = arith.constant 0 : index
      %235 = vector.load %arg29[%c0_132, %c0_133] : memref<32x128xf32, #tpu.memory_space<vmem>>, vector<32x128xf32>
      %236 = arith.truncf %230 : vector<8x32xf32> to vector<8x32xbf16>
      %237 = arith.truncf %235 : vector<32x128xf32> to vector<32x128xbf16>
      %cst_134 = arith.constant dense<0.000000e+00> : vector<8x128xf32>
      %238 = tpu.matmul %236, %237, %cst_134 {dimension_numbers = #tpu.dot_dimension_numbers<[1], [0], [0], [1], [0, 0, 1, 1], [], []>} : vector<8x32xbf16>, vector<32x128xbf16>, vector<8x128xf32> -> vector<8x128xf32>
      %c0_135 = arith.constant 0 : index
      %c0_136 = arith.constant 0 : index
      %239 = vector.load %arg30[%c0_135, %c0_136] : memref<1x128xf32, #tpu.memory_space<vmem>>, vector<1x128xf32>
      %240 = vector.broadcast %239 : vector<1x128xf32> to vector<8x128xf32>
      %241 = arith.addf %238, %240 : vector<8x128xf32>
      %c0_137 = arith.constant 0 : index
      %c0_138 = arith.constant 0 : index
      %c0_139 = arith.constant 0 : index
      %242 = vector.load %arg37[%c0_137, %c0_138, %c0_139] : memref<1x8x128xf32, #tpu.memory_space<vmem>>, vector<1x8x128xf32>
      %243 = vector.shape_cast %242 : vector<1x8x128xf32> to vector<8x128xf32>
      %244 = vector.shape_cast %241 : vector<8x128xf32> to vector<1x8x128xf32>
      tpu.vector_store %arg37[%c0_137, %c0_138, %c0_139], %244 {strides = array<i32>} : memref<1x8x128xf32, #tpu.memory_space<vmem>>, vector<1x8x128xf32>,
      %c0_140 = arith.constant 0 : index
      %c0_141 = arith.constant 0 : index
      %245 = vector.load %arg31[%c0_140, %c0_141] : memref<32x32xf32, #tpu.memory_space<vmem>>, vector<32x32xf32>
      %246 = arith.truncf %230 : vector<8x32xf32> to vector<8x32xbf16>
      %247 = arith.truncf %245 : vector<32x32xf32> to vector<32x32xbf16>
      %cst_142 = arith.constant dense<0.000000e+00> : vector<8x32xf32>
      %248 = tpu.matmul %246, %247, %cst_142 {dimension_numbers = #tpu.dot_dimension_numbers<[1], [0], [0], [1], [0, 0, 1, 1], [], []>} : vector<8x32xbf16>, vector<32x32xbf16>, vector<8x32xf32> -> vector<8x32xf32>
      %c0_143 = arith.constant 0 : index
      %c0_144 = arith.constant 0 : index
      %249 = vector.load %arg32[%c0_143, %c0_144] : memref<1x32xf32, #tpu.memory_space<vmem>>, vector<1x32xf32>
      %250 = vector.broadcast %249 : vector<1x32xf32> to vector<8x32xf32>
      %251 = arith.addf %248, %250 : vector<8x32xf32>
      %cst_145 = arith.constant 0.000000e+00 : f32
      %252 = vector.broadcast %cst_145 : f32 to vector<8x32xf32>
      %253 = arith.maximumf %251, %252 : vector<8x32xf32>
      %c0_146 = arith.constant 0 : index
      %c0_147 = arith.constant 0 : index
      %254 = vector.load %arg33[%c0_146, %c0_147] : memref<32x32xf32, #tpu.memory_space<vmem>>, vector<32x32xf32>
      %255 = arith.truncf %253 : vector<8x32xf32> to vector<8x32xbf16>
      %256 = arith.truncf %254 : vector<32x32xf32> to vector<32x32xbf16>
      %cst_148 = arith.constant dense<0.000000e+00> : vector<8x32xf32>
      %257 = tpu.matmul %255, %256, %cst_148 {dimension_numbers = #tpu.dot_dimension_numbers<[1], [0], [0], [1], [0, 0, 1, 1], [], []>} : vector<8x32xbf16>, vector<32x32xbf16>, vector<8x32xf32> -> vector<8x32xf32>
      %c0_149 = arith.constant 0 : index
      %c0_150 = arith.constant 0 : index
      %258 = vector.load %arg34[%c0_149, %c0_150] : memref<1x32xf32, #tpu.memory_space<vmem>>, vector<1x32xf32>
      %259 = vector.broadcast %258 : vector<1x32xf32> to vector<8x32xf32>
      %260 = arith.addf %257, %259 : vector<8x32xf32>
      %cst_151 = arith.constant 0.000000e+00 : f32
      %261 = vector.broadcast %cst_151 : f32 to vector<8x32xf32>
      %262 = arith.maximumf %260, %261 : vector<8x32xf32>
      %c0_152 = arith.constant 0 : index
      %c0_153 = arith.constant 0 : index
      %263 = vector.load %arg35[%c0_152, %c0_153] : memref<32x32xf32, #tpu.memory_space<vmem>>, vector<32x32xf32>
      %264 = arith.truncf %262 : vector<8x32xf32> to vector<8x32xbf16>
      %265 = arith.truncf %263 : vector<32x32xf32> to vector<32x32xbf16>
      %cst_154 = arith.constant dense<0.000000e+00> : vector<8x32xf32>
      %266 = tpu.matmul %264, %265, %cst_154 {dimension_numbers = #tpu.dot_dimension_numbers<[1], [0], [0], [1], [0, 0, 1, 1], [], []>} : vector<8x32xbf16>, vector<32x32xbf16>, vector<8x32xf32> -> vector<8x32xf32>
      %c0_155 = arith.constant 0 : index
      %c0_156 = arith.constant 0 : index
      %267 = vector.load %arg36[%c0_155, %c0_156] : memref<1x32xf32, #tpu.memory_space<vmem>>, vector<1x32xf32>
      %268 = vector.broadcast %267 : vector<1x32xf32> to vector<8x32xf32>
      %269 = arith.addf %266, %268 : vector<8x32xf32>
      %270 = arith.truncf %269 : vector<8x32xf32> to vector<8x32xbf16>
      %cst_157 = arith.constant dense<0.000000e+00> : vector<8x16xf32>
      %271 = tpu.matmul %270, %5, %cst_157 {dimension_numbers = #tpu.dot_dimension_numbers<[1], [1], [0], [0], [0, 0, 1, 0], [], []>} : vector<8x32xbf16>, vector<16x32xbf16>, vector<8x16xf32> -> vector<8x16xf32>
      %c0_158 = arith.constant 0 : index
      %c0_159 = arith.constant 0 : index
      %c0_160 = arith.constant 0 : index
      %272 = vector.load %arg38[%c0_158, %c0_159, %c0_160] : memref<1x8x16xf32, #tpu.memory_space<vmem>>, vector<1x8x16xf32>
      %273 = vector.shape_cast %272 : vector<1x8x16xf32> to vector<8x16xf32>
      %274 = vector.shape_cast %271 : vector<8x16xf32> to vector<1x8x16xf32>
      tpu.vector_store %arg38[%c0_158, %c0_159, %c0_160], %274 {strides = array<i32>} : memref<1x8x16xf32, #tpu.memory_space<vmem>>, vector<1x8x16xf32>,
    } else {
    }
    return
  }
  func.func @transform_0(%arg0: i32, %arg1: i32) -> (i32, i32, i32) {
    %c0_i32 = arith.constant 0 : i32
    %c0_i32_0 = arith.constant 0 : i32
    %c0_i32_1 = arith.constant 0 : i32
    return %arg0, %c0_i32, %c0_i32_0 : i32, i32, i32
  }
  func.func @transform_1(%arg0: i32, %arg1: i32) -> (i32, i32) {
    %c0_i32 = arith.constant 0 : i32
    %c0_i32_0 = arith.constant 0 : i32
    %c0_i32_1 = arith.constant 0 : i32
    return %c0_i32, %c0_i32_0 : i32, i32
  }
  func.func @transform_2(%arg0: i32, %arg1: i32) -> (i32, i32) {
    %c0_i32 = arith.constant 0 : i32
    %c0_i32_0 = arith.constant 0 : i32
    %c0_i32_1 = arith.constant 0 : i32
    return %c0_i32, %c0_i32_0 : i32, i32
  }
  func.func @transform_3(%arg0: i32, %arg1: i32) -> (i32, i32) {
    %c0_i32 = arith.constant 0 : i32
    %c0_i32_0 = arith.constant 0 : i32
    %c0_i32_1 = arith.constant 0 : i32
    return %c0_i32, %c0_i32_0 : i32, i32
  }
  func.func @transform_4(%arg0: i32, %arg1: i32) -> (i32, i32) {
    %c0_i32 = arith.constant 0 : i32
    %c0_i32_0 = arith.constant 0 : i32
    %c0_i32_1 = arith.constant 0 : i32
    return %c0_i32, %c0_i32_0 : i32, i32
  }
  func.func @transform_5(%arg0: i32, %arg1: i32) -> (i32, i32) {
    %c0_i32 = arith.constant 0 : i32
    %c0_i32_0 = arith.constant 0 : i32
    %c0_i32_1 = arith.constant 0 : i32
    return %c0_i32, %c0_i32_0 : i32, i32
  }
  func.func @transform_6(%arg0: i32, %arg1: i32) -> (i32, i32) {
    %c0_i32 = arith.constant 0 : i32
    %c0_i32_0 = arith.constant 0 : i32
    %c0_i32_1 = arith.constant 0 : i32
    return %c0_i32, %c0_i32_0 : i32, i32
  }
  func.func @transform_7(%arg0: i32, %arg1: i32) -> (i32, i32) {
    %c0_i32 = arith.constant 0 : i32
    %c0_i32_0 = arith.constant 0 : i32
    %c0_i32_1 = arith.constant 0 : i32
    return %c0_i32, %c0_i32_0 : i32, i32
  }
  func.func @transform_8(%arg0: i32, %arg1: i32) -> (i32, i32) {
    %c0_i32 = arith.constant 0 : i32
    %c0_i32_0 = arith.constant 0 : i32
    %c0_i32_1 = arith.constant 0 : i32
    return %c0_i32, %c0_i32_0 : i32, i32
  }
  func.func @transform_9(%arg0: i32, %arg1: i32) -> (i32, i32, i32, i32) {
    %c0_i32 = arith.constant 0 : i32
    %c0_i32_0 = arith.constant 0 : i32
    %c0_i32_1 = arith.constant 0 : i32
    %c0_i32_2 = arith.constant 0 : i32
    return %arg1, %c0_i32, %c0_i32_0, %c0_i32_1 : i32, i32, i32, i32
  }
  func.func @transform_10(%arg0: i32, %arg1: i32) -> (i32, i32, i32, i32) {
    %c0_i32 = arith.constant 0 : i32
    %c0_i32_0 = arith.constant 0 : i32
    %c0_i32_1 = arith.constant 0 : i32
    %c0_i32_2 = arith.constant 0 : i32
    return %arg1, %c0_i32, %c0_i32_0, %c0_i32_1 : i32, i32, i32, i32
  }
  func.func @transform_11(%arg0: i32, %arg1: i32) -> (i32, i32, i32) {
    %c0_i32 = arith.constant 0 : i32
    %c0_i32_0 = arith.constant 0 : i32
    %c0_i32_1 = arith.constant 0 : i32
    return %arg1, %c0_i32, %c0_i32_0 : i32, i32, i32
  }
  func.func @transform_12(%arg0: i32, %arg1: i32) -> (i32, i32, i32) {
    %c0_i32 = arith.constant 0 : i32
    %c0_i32_0 = arith.constant 0 : i32
    %c0_i32_1 = arith.constant 0 : i32
    return %arg1, %c0_i32, %c0_i32_0 : i32, i32, i32
  }
  func.func @transform_13(%arg0: i32, %arg1: i32) -> (i32, i32, i32) {
    %c0_i32 = arith.constant 0 : i32
    %c0_i32_0 = arith.constant 0 : i32
    %c0_i32_1 = arith.constant 0 : i32
    return %arg1, %c0_i32, %c0_i32_0 : i32, i32, i32
  }
  func.func @transform_14(%arg0: i32, %arg1: i32) -> (i32, i32, i32) {
    %c0_i32 = arith.constant 0 : i32
    %c0_i32_0 = arith.constant 0 : i32
    %c0_i32_1 = arith.constant 0 : i32
    return %arg1, %c0_i32, %c0_i32_0 : i32, i32, i32
  }
  func.func @transform_15(%arg0: i32, %arg1: i32) -> (i32, i32, i32, i32) {
    %c0_i32 = arith.constant 0 : i32
    %c0_i32_0 = arith.constant 0 : i32
    %c0_i32_1 = arith.constant 0 : i32
    %c0_i32_2 = arith.constant 0 : i32
    return %arg1, %c0_i32, %c0_i32_0, %c0_i32_1 : i32, i32, i32, i32
  }
  func.func @transform_16(%arg0: i32, %arg1: i32) -> (i32, i32, i32, i32) {
    %c0_i32 = arith.constant 0 : i32
    %c0_i32_0 = arith.constant 0 : i32
    %c0_i32_1 = arith.constant 0 : i32
    %c0_i32_2 = arith.constant 0 : i32
    return %arg1, %c0_i32, %c0_i32_0, %c0_i32_1 : i32, i32, i32, i32
  }
  func.func @transform_17(%arg0: i32, %arg1: i32) -> (i32, i32, i32) {
    %c0_i32 = arith.constant 0 : i32
    %c0_i32_0 = arith.constant 0 : i32
    %c0_i32_1 = arith.constant 0 : i32
    return %arg1, %c0_i32, %c0_i32_0 : i32, i32, i32
  }
  func.func @transform_18(%arg0: i32, %arg1: i32) -> (i32, i32, i32) {
    %c0_i32 = arith.constant 0 : i32
    %c0_i32_0 = arith.constant 0 : i32
    %c0_i32_1 = arith.constant 0 : i32
    return %arg1, %c0_i32, %c0_i32_0 : i32, i32, i32
  }
  func.func @transform_19(%arg0: i32, %arg1: i32) -> (i32, i32, i32) {
    %c0_i32 = arith.constant 0 : i32
    %c0_i32_0 = arith.constant 0 : i32
    %c0_i32_1 = arith.constant 0 : i32
    return %arg1, %c0_i32, %c0_i32_0 : i32, i32, i32
  }
  func.func @transform_20(%arg0: i32, %arg1: i32) -> (i32, i32, i32) {
    %c0_i32 = arith.constant 0 : i32
    %c0_i32_0 = arith.constant 0 : i32
    %c0_i32_1 = arith.constant 0 : i32
    return %arg1, %c0_i32, %c0_i32_0 : i32, i32, i32
  }
  func.func @transform_21(%arg0: i32, %arg1: i32) -> (i32, i32, i32) {
    %c0_i32 = arith.constant 0 : i32
    %c0_i32_0 = arith.constant 0 : i32
    %c0_i32_1 = arith.constant 0 : i32
    return %arg1, %c0_i32, %c0_i32_0 : i32, i32, i32
  }
  func.func @transform_22(%arg0: i32, %arg1: i32) -> (i32, i32, i32) {
    %c0_i32 = arith.constant 0 : i32
    %c0_i32_0 = arith.constant 0 : i32
    %c0_i32_1 = arith.constant 0 : i32
    return %arg1, %c0_i32, %c0_i32_0 : i32, i32, i32
  }
  func.func @transform_23(%arg0: i32, %arg1: i32) -> (i32, i32, i32) {
    %c0_i32 = arith.constant 0 : i32
    %c0_i32_0 = arith.constant 0 : i32
    %c0_i32_1 = arith.constant 0 : i32
    return %arg1, %c0_i32, %c0_i32_0 : i32, i32, i32
  }
  func.func @transform_24(%arg0: i32, %arg1: i32) -> (i32, i32, i32) {
    %c0_i32 = arith.constant 0 : i32
    %c0_i32_0 = arith.constant 0 : i32
    %c0_i32_1 = arith.constant 0 : i32
    return %arg1, %c0_i32, %c0_i32_0 : i32, i32, i32
  }
  func.func @transform_25(%arg0: i32, %arg1: i32) -> (i32, i32, i32) {
    %c0_i32 = arith.constant 0 : i32
    %c0_i32_0 = arith.constant 0 : i32
    %c0_i32_1 = arith.constant 0 : i32
    return %arg1, %c0_i32, %c0_i32_0 : i32, i32, i32
  }
  func.func @transform_26(%arg0: i32, %arg1: i32) -> (i32, i32, i32) {
    %c0_i32 = arith.constant 0 : i32
    %c0_i32_0 = arith.constant 0 : i32
    %c0_i32_1 = arith.constant 0 : i32
    return %arg1, %c0_i32, %c0_i32_0 : i32, i32, i32
  }
  func.func @transform_27(%arg0: i32, %arg1: i32) -> (i32, i32) {
    %c0_i32 = arith.constant 0 : i32
    %c0_i32_0 = arith.constant 0 : i32
    %c0_i32_1 = arith.constant 0 : i32
    return %c0_i32, %c0_i32_0 : i32, i32
  }
  func.func @transform_28(%arg0: i32, %arg1: i32) -> (i32, i32) {
    %c0_i32 = arith.constant 0 : i32
    %c0_i32_0 = arith.constant 0 : i32
    %c0_i32_1 = arith.constant 0 : i32
    return %c0_i32, %c0_i32_0 : i32, i32
  }
  func.func @transform_29(%arg0: i32, %arg1: i32) -> (i32, i32) {
    %c0_i32 = arith.constant 0 : i32
    %c0_i32_0 = arith.constant 0 : i32
    %c0_i32_1 = arith.constant 0 : i32
    return %c0_i32, %c0_i32_0 : i32, i32
  }
  func.func @transform_30(%arg0: i32, %arg1: i32) -> (i32, i32) {
    %c0_i32 = arith.constant 0 : i32
    %c0_i32_0 = arith.constant 0 : i32
    %c0_i32_1 = arith.constant 0 : i32
    return %c0_i32, %c0_i32_0 : i32, i32
  }
  func.func @transform_31(%arg0: i32, %arg1: i32) -> (i32, i32) {
    %c0_i32 = arith.constant 0 : i32
    %c0_i32_0 = arith.constant 0 : i32
    %c0_i32_1 = arith.constant 0 : i32
    return %c0_i32, %c0_i32_0 : i32, i32
  }
  func.func @transform_32(%arg0: i32, %arg1: i32) -> (i32, i32) {
    %c0_i32 = arith.constant 0 : i32
    %c0_i32_0 = arith.constant 0 : i32
    %c0_i32_1 = arith.constant 0 : i32
    return %c0_i32, %c0_i32_0 : i32, i32
  }
  func.func @transform_33(%arg0: i32, %arg1: i32) -> (i32, i32) {
    %c0_i32 = arith.constant 0 : i32
    %c0_i32_0 = arith.constant 0 : i32
    %c0_i32_1 = arith.constant 0 : i32
    return %c0_i32, %c0_i32_0 : i32, i32
  }
  func.func @transform_34(%arg0: i32, %arg1: i32) -> (i32, i32) {
    %c0_i32 = arith.constant 0 : i32
    %c0_i32_0 = arith.constant 0 : i32
    %c0_i32_1 = arith.constant 0 : i32
    return %c0_i32, %c0_i32_0 : i32, i32
  }
  func.func @transform_35(%arg0: i32, %arg1: i32) -> (i32, i32, i32) {
    %c0_i32 = arith.constant 0 : i32
    %c0_i32_0 = arith.constant 0 : i32
    %c0_i32_1 = arith.constant 0 : i32
    return %arg0, %c0_i32, %c0_i32_0 : i32, i32, i32
  }
  func.func @transform_36(%arg0: i32, %arg1: i32) -> (i32, i32, i32) {
    %c0_i32 = arith.constant 0 : i32
    %c0_i32_0 = arith.constant 0 : i32
    %c0_i32_1 = arith.constant 0 : i32
    return %arg0, %c0_i32, %c0_i32_0 : i32, i32, i32
  }
}

</mosaic_0001>

<bundles_post_ra>
// kernel: mask2former_forward.1
= control target key start
LH: loop header
LB: loop body
LE: loop exit
PB: predicated region body
PF: predicated region fallthrough
CT: control target
= control target key end

     0   :  { %s5040_s6 = smov 1   ;;  %s5041_s10 = smov 2   ;;  %s5835_s0 = inlined_call_operand.smem [shape: u32[37], index: -1, kind: input, shape index: {}] }
   0x1   :  { %s5094_s5 = sld [smem:[%s5835_s0]]   ;;  %s5042_s14 = smov 3  }
   0x2   :  { %s5099_s9 = sld [smem:[%s5835_s0 + %s5040_s6]]   ;;  %s5043_s18 = smov 4  }
   0x3   :  { %s5104_s13 = sld [smem:[%s5835_s0 + %s5041_s10]]   ;;  %s5044_s22 = smov 5  }
   0x4   :  { %s5109_s17 = sld [smem:[%s5835_s0 + %s5042_s14]]   ;;  %s5045_s26 = smov 6  }
   0x5   :  { %s5114_s21 = sld [smem:[%s5835_s0 + %s5043_s18]]   ;;  %s5046_s30 = smov 7  }
   0x6   :  { %s5119_s25 = sld [smem:[%s5835_s0 + %s5044_s22]]   ;;  %s5047_s4 = smov 8  }
   0x7   :  { %5851 = sst [smem:[#allocation4_spill]] %s5094_s5  ;;  %s5048_s10 = smov 9  }
   0x8   :  { %5852 = sst [smem:[#allocation5_spill]] %s5099_s9  ;;  %s5049_s15 = smov 10  }
   0x9   :  { %5853 = sst [smem:[#allocation6_spill]] %s5104_s13  ;;  %s5050_s20 = smov 11  }
   0xa   :  { %5854 = sst [smem:[#allocation7_spill]] %s5109_s17  ;;  %s5052_s1 = smov 13  }
   0xb   :  { %5855 = sst [smem:[#allocation8_spill]] %s5114_s21  ;;  %s5053_s7 = smov 14  }
   0xc   :  { %5856 = sst [smem:[#allocation9_spill]] %s5119_s25  ;;  %s5055_s22 = smov 16  }
   0xd   :  { %s5124_s29 = sld [smem:[%s5835_s0 + %s5045_s26]]   ;;  %s5051_s26 = smov 12  }
   0xe   :  { %s5129_s3 = sld [smem:[%s5835_s0 + %s5046_s30]]   ;;  %s5056_s28 = smov 17  }
   0xf   :  { %s5134_s8 = sld [smem:[%s5835_s0 + %s5047_s4]]   ;;  %s5280_s2 = smov 0  }
  0x10   :  { %s5139_s14 = sld [smem:[%s5835_s0 + %s5048_s10]]   ;;  %s5284_s10 = smov 0  }
  0x11   :  { %s5144_s19 = sld [smem:[%s5835_s0 + %s5049_s15]]   ;;  %s5054_s15 = smov 15  }
  0x12   :  { %s5149_s24 = sld [smem:[%s5835_s0 + %s5050_s20]]  }
  0x13   :  { %5857 = sst [smem:[#allocation10_spill]] %s5124_s29 }
  0x14   :  { %5858 = sst [smem:[#allocation11_spill]] %s5129_s3 }
  0x15   :  { %5859 = sst [smem:[#allocation12_spill]] %s5134_s8 }
  0x16   :  { %5860 = sst [smem:[#allocation13_spill]] %s5139_s14 }
  0x17   :  { %5861 = sst [smem:[#allocation14_spill]] %s5144_s19 }
  0x18   :  { %5862 = sst [smem:[#allocation15_spill]] %s5149_s24 }
  0x19   :  { %s5154_s30 = sld [smem:[%s5835_s0 + %s5051_s26]]  }
  0x1a   :  { %s5159_s6 = sld [smem:[%s5835_s0 + %s5052_s1]]   ;;  %s5278_s1 = smov 0  }
  0x1b   :  { %s5164_s12 = sld [smem:[%s5835_s0 + %s5053_s7]]   ;;  %s5057_s7 = smov 18  }
  0x1c   :  { %s5169_s20 = sld [smem:[%s5835_s0 + %s5054_s15]]   ;;  %s5058_s15 = smov 19  }
  0x1d   :  { %s5174_s27 = sld [smem:[%s5835_s0 + %s5055_s22]]   ;;  %s5059_s22 = smov 20  }
  0x1e   :  { %s5179_s4 = sld [smem:[%s5835_s0 + %s5056_s28]]   ;;  %s5060_s28 = smov 21  }
  0x1f   :  { %5863 = sst [smem:[#allocation16_spill]] %s5154_s30 }
  0x20   :  { %5864 = sst [smem:[#allocation17_spill]] %s5159_s6 }
  0x21   :  { %5865 = sst [smem:[#allocation18_spill]] %s5164_s12 }
  0x22   :  { %5866 = sst [smem:[#allocation19_spill]] %s5169_s20 }
  0x23   :  { %s5184_s8 = sld [smem:[%s5835_s0 + %s5057_s7]]   ;;  %s5061_s7 = smov 22  }
  0x24   :  { %5867 = sst [smem:[#allocation20_spill]] %s5179_s4 }
  0x25   :  { %s5189_s29 = sld [smem:[%s5835_s0 + %s5058_s15]]   ;;  %s5062_s15 = smov 23  }
  0x26   :  { %s5194_s21 = sld [smem:[%s5835_s0 + %s5059_s22]]   ;;  %s5063_s22 = smov 24  }
  0x27   :  { %s5199_s17 = sld [smem:[%s5835_s0 + %s5060_s28]]   ;;  %s5064_s28 = smov 25  }
  0x28   :  { %s5204_s25 = sld [smem:[%s5835_s0 + %s5061_s7]]   ;;  %s5065_s7 = smov 26  }
  0x29   :  { %s5209_s13 = sld [smem:[%s5835_s0 + %s5062_s15]]   ;;  %s5066_s15 = smov 27  }
  0x2a   :  { %s5214_s3 = sld [smem:[%s5835_s0 + %s5063_s22]]   ;;  %s5067_s22 = smov 28  }
  0x2b   :  { %s5219_s9 = sld [smem:[%s5835_s0 + %s5064_s28]]   ;;  %s5068_s28 = smov 29  }
  0x2e   :  { %5868 = sst [smem:[#allocation21_spill]] %s5204_s25 }
  0x2f   :  { %5869 = sst [smem:[#allocation22_spill]] %s5209_s13 }
  0x30   :  { %5870 = sst [smem:[#allocation23_spill]] %s5214_s3 }
  0x31   :  { %5871 = sst [smem:[#allocation24_spill]] %s5219_s9 }
  0x32   :  { %s5224_s25 = sld [smem:[%s5835_s0 + %s5065_s7]]   ;;  %s5069_s7 = smov 30  }
  0x33   :  { %s5229_s13 = sld [smem:[%s5835_s0 + %s5066_s15]]   ;;  %s5070_s15 = smov 31  }
  0x34   :  { %s5234_s3 = sld [smem:[%s5835_s0 + %s5067_s22]]   ;;  %s5071_s22 = smov 32  }
  0x35   :  { %s5239_s9 = sld [smem:[%s5835_s0 + %s5068_s28]]   ;;  %s5072_s28 = smov 33  }
  0x38   :  { %5872 = sst [smem:[#allocation25_spill]] %s5224_s25 }
  0x39   :  { %5873 = sst [smem:[#allocation26_spill]] %s5229_s13 }
  0x3a   :  { %5874 = sst [smem:[#allocation27_spill]] %s5234_s3 }
  0x3b   :  { %5875 = sst [smem:[#allocation28_spill]] %s5239_s9 }
  0x3c   :  { %s5244_s25 = sld [smem:[%s5835_s0 + %s5069_s7]]   ;;  %s5073_s7 = smov 34  }
  0x3d   :  { %s5249_s13 = sld [smem:[%s5835_s0 + %s5070_s15]]   ;;  %s5074_s15 = smov 35  }
  0x3e   :  { %s5254_s3 = sld [smem:[%s5835_s0 + %s5071_s22]]   ;;  %s5075_s22 = smov 36  }
  0x3f   :  { %s5259_s9 = sld [smem:[%s5835_s0 + %s5072_s28]]   ;;  %s5276_s28 = smov 0  }
  0x42   :  { %5876 = sst [smem:[#allocation29_spill]] %s5244_s25 }
  0x43   :  { %5877 = sst [smem:[#allocation30_spill]] %s5249_s13 }
  0x44   :  { %5878 = sst [smem:[#allocation31_spill]] %s5254_s3 }
  0x45   :  { %5879 = sst [smem:[#allocation32_spill]] %s5259_s9 }
  0x46   :  { %s5264_s25 = sld [smem:[%s5835_s0 + %s5073_s7]]   ;;  %s5282_s7 = smov 0  }
  0x47   :  { %s5269_s13 = sld [smem:[%s5835_s0 + %s5074_s15]]  }
  0x48   :  { %s5274_s3 = sld [smem:[%s5835_s0 + %s5075_s22]]  }
  0x4c   :  { %5880 = sst [smem:[#allocation33_spill]] %s5264_s25 }
  0x4d LB: > { %5881 = sst [smem:[#allocation34_spill]] %s5022_s28  ;;  %s93_s0 = sadd.s32 1, %s5030_s2  ;;  %s5038_s10 = sphi %s5284_s10, %s84_s10   ;;  %s5034_s7 = sphi %s5282_s7, %s5946_s7   ;;  %s5030_s2 = sphi %s5280_s2, %s5945_s2   ;;  %s5026_s1 = sphi %s5278_s1, %s5944_s1   ;;  %s5022_s28 = sphi %s5276_s28, %s5943_s28  }
  0x4e   : > { %5882 = sst [smem:[#allocation35_spill]] %s5030_s2  ;;  %s96_s11 = sadd.s32 1, %s5034_s7 }
  0x4f   : > { %5883 = sst [smem:[#allocation36_spill]] %s5034_s7  ;;  %p94_p0 = scmp.ge.s32.totalorder %s93_s0, 2 }
  0x50   : > { %5884 = sst [smem:[#allocation37_spill]] %s5038_s10  ;;  %p4512_p1 = scmp.ge.s32.totalorder %s5038_s10, 1 }
  0x51   : > { %p1172_p2 = scmp.lt.s32.totalorder %s5038_s10, 5  ;;  %s5948_s0 = smov (%p94_p0, %s93_s0), 0 }
  0x52   : > { %5885 = sst [smem:[#allocation38_spill]] %s5948_s0  ;;  %s5950_s11 = smov (!%p94_p0, %s96_s11), %s5034_s7 }
  0x53   : > { %p1173_p3 = pnand %p4512_p1, %p1172_p2  ;;  %p98_p4 = scmp.ge.s32.totalorder %s5950_s11, 2 }
  0x55   : > { %s5952_s11 = smov (%p98_p4, %s5950_s11), 0  ;;  %1176 = sbr.rel (%p1173_p3) target bundleno = 6106 (0x17da), region = 160 }
  0x56   : > { %5886 = sst [smem:[#allocation39_spill]] %s5952_s11 }
  0x5c   : > { %p1333_p5 = scmp.lt.s32.totalorder %s5026_s1, 1  ;;  %s5887_s5 = sld [smem:[#allocation4_spill]] }
  0x5d   : > { %s5888_s14 = sld [smem:[#allocation13_spill]]  ;;  %s5889_s24 = sld [smem:[#allocation15_spill]] }
  0x5e   : > { %s5890_s19 = sld [smem:[#allocation14_spill]]  ;;  %s5894_s20 = sld [smem:[#allocation19_spill]] }
  0x5f   : > { %p1338_p6 = scmp.lt.s32.totalorder %s5022_s28, 1  ;;  %s5954_s1 = smov (!%p1333_p5, %s5026_s1), 1 }
  0x60   : > { %s5895_s4 = sld [smem:[#allocation20_spill]]  ;;  %s4620_s16 = sshll.u32 %s5954_s1, 4 }
  0x61   : > { %s5312_s15 = scalar_select %p1338_p6, %s5022_s28, 1 }
  0x62   : > { %s4525_s18 = sshll.u32 %s5954_s1, 3  ;;  %s5317_s22 = scalar_lea.vmem %s5887_s5, %s4620_s16 }
  0x63   : > { %5896 = sst [smem:[#allocation40_spill]] %s5317_s22  ;;  %s4882_s23 = smul.u32 96, %s5312_s15 }
  0x64   : > { %s5897_s26 = sld [smem:[#allocation21_spill]]  ;;  %s4883_s11 = smul.u32 3, %s5312_s15 }
  0x65   : > { %s4621_s0 = sshll.u32 %s5312_s15, 5  ;;  %s5898_s7 = sld [smem:[#allocation23_spill]] }
  0x66   : > { %s5323_s2 = scalar_lea.vmem %s5888_s14, %s4882_s23  ;;  %s5900_s10 = sld [smem:[#allocation22_spill]] }
  0x67   : > { %5899 = sst [smem:[#allocation41_spill]] %s5323_s2  ;;  %s5326_s25 = scalar_lea.vmem %s5889_s24, %s4621_s0 }
  0x68   : > { %5901 = sst [smem:[#allocation42_spill]] %s5326_s25  ;;  %s5902_s1 = sld [smem:[#allocation24_spill]] }
  0x69   : > { %s5329_s9 = scalar_lea.vmem %s5890_s19, %s4883_s11  ;;  %s5904_s5 = sld [smem:[#allocation25_spill]] }
  0x6a   : > { %5903 = sst [smem:[#allocation43_spill]] %s5329_s9  ;;  %s5338_s14 = scalar_lea.vmem %s5894_s20, %s4882_s23 }
  0x6b   : > { %5905 = sst [smem:[#allocation44_spill]] %s5338_s14  ;;  %s5341_s2 = scalar_lea.vmem %s5174_s27, %s4883_s11 }
  0x6c   : > { %s5344_s24 = scalar_lea.vmem %s5895_s4, %s4621_s0  ;;  %s1377_s25 = scalar_lea.vmem %s5184_s8, %s5312_s15 }
  0x6d   : > { %s1380_s19 = scalar_lea.vmem %s5189_s29, %s5312_s15  ;;  %s1383_s9 = scalar_lea.vmem %s5194_s21, %s5312_s15 }
  0x6e   : > { %s5353_s16 = scalar_lea.vmem %s5199_s17, %s4621_s0  ;;  %s1391_s30 = scalar_lea.vmem %s5897_s26, %s5312_s15 }
  0x6f   : > { %s4624_s6 = sshll.u32 %s5312_s15, 6  ;;  %s1399_s22 = scalar_lea.vmem %s5898_s7, %s5312_s15 }
  0x70   : > { %s5361_s12 = scalar_lea.vmem %s5900_s10, %s4624_s6  ;;  %s1402_s28 = scalar_lea.vmem %s5902_s1, %s5312_s15 }
  0x71   : > { %s1405_s20 = scalar_lea.vmem %s5904_s5, %s5312_s15  ;;  %s5368_s23 = scalar_lea.vmem %s5269_s13, %s4525_s18 }
  0x72   : > { %s5371_s14 = scalar_lea.vmem %s5274_s3, %s4525_s18  ;;  %s5906_s11 = sld [smem:[#allocation34_spill]] }
  0x78   : > { %p4527_p7 = scmp.ne.s32.totalorder %s5906_s11, 0 }
  0x79   : > { %s5907_s4 = sld [smem:[#allocation5_spill]] (!%p4527_p7)  ;;  %s5908_s6 = sld [smem:[#allocation40_spill]] (!%p4527_p7)  ;;  %v5076_v3 = vmov (!%p4527_p7), 0.0   ;;  %vm5077_vm0 = vmmov (!%p4527_p7), 0   ;;  %vm1438_vm1 = vcmask (!%p4527_p7), 392192   ;;  %vm1485_vm2 = vcmask (!%p4527_p7), 261120  }
  0x7a   : > { %1418 = sbr.rel (%p4527_p7) target bundleno = 920 (0x398), region = 164  ;;  %4694 = vmatprep.subr.bf16.mxu0 (!%p4527_p7), %v5076_v3  ;;  %4700 = vmatprep.mubr.msk.bf16.mxu0 (!%p4527_p7), %vm5077_vm0, %v5076_v3  ;;  %s5909_s5 = sld [smem:[#allocation11_spill]] (!%p4527_p7) }
  0x7b   : > { %4704 = vmatprep.subr.bf16.mxu1 (!%p4527_p7), %v5076_v3  ;;  %4708 = vmatprep.mubr.msk.bf16.mxu1 (!%p4527_p7), %vm5077_vm0, %v5076_v3  ;;  %s5910_s7 = sld [smem:[#allocation6_spill]] (!%p4527_p7)  ;;  %s5911_s10 = sld [smem:[#allocation9_spill]] (!%p4527_p7) }
  0x7c   : > { %s5913_s18 = sld [smem:[#allocation7_spill]] (!%p4527_p7)  ;;  %s5914_s26 = sld [smem:[#allocation8_spill]] (!%p4527_p7) }
  0x7d   : > { %s5915_s1 = sld [smem:[#allocation10_spill]] (!%p4527_p7) }
  0x7f   : > { %v1421_v0 = vld [vmem:[%s5907_s4] sm:$0xff] (!%p4527_p7)  ;;  %v1422_v1 = vld [vmem:[%s5907_s4 + $0x8] sm:$0xff] (!%p4527_p7)  ;;  %v1423_v2 = vld [vmem:[%s5907_s4 + $0x10] sm:$0xff] (!%p4527_p7) }
  0x80   : > { %v1428_v4 = vpack.c.bf16 (!%p4527_p7), %v1422_v1, %v1421_v0  ;;  %v1424_v5 = vld [vmem:[%s5907_s4 + $0x18] sm:$0xff] (!%p4527_p7)  ;;  %v1425_v7 = vld [vmem:[%s5907_s4 + $0x20] sm:$0xff] (!%p4527_p7)  ;;  %v1426_v8 = vld [vmem:[%s5907_s4 + $0x28] sm:$0xff] (!%p4527_p7) }
  0x81   : > { %v1429_v6 = vpack.c.bf16 %v1424_v5, %v1423_v2  ;;  %v1430_v9 = vpack.c.bf16 %v1426_v8, %v1425_v7  ;;  %v1419_v10 = vld [vmem:[%s5908_s6] sm:$0xff]  ;;  %v1420_v11 = vld [vmem:[%s5908_s6 + $0x8] sm:$0xff]  ;;  %s5912_s0 = smov %s5911_s10 }
  0x82   : > { %4695 = vmatpush3.bf16.msra.mxu0 %v1428_v4  ;;  %v1427_v12 = vpack.c.bf16 %v1420_v11, %v1419_v10  ;;  %v1607_v13 = vld [vmem:[%s5909_s5] sm:$0xff]  ;;  %v1530_v34 = vld [vmem:[%s5912_s0 + $0x8] sm:$0xff]  ;;  %v1531_v36 = vld [vmem:[%s5912_s0 + $0x10] sm:$0xff] }
  0x83   : > { %4696 = vmatprep.subr.bf16.mxu0 %v5076_v3  ;;  %1608 = vst.msk [vmem:[#allocation2] sm:$0xff] %vm1485_vm2, %v1607_v13  ;;  %v4528_v14 = vld [vmem:[%s5910_s7] ss:$0 sm:$0xff]  ;;  %v1532_v37 = vld [vmem:[%s5912_s0 + $0x18] sm:$0xff] }
  0x84   : > { %v1529_v33 = vld [vmem:[%s5911_s10] sm:$0xff]  ;;  %v1535_v38 = vpack.c.bf16 %v1532_v37, %v1531_v36 }
  0x85   : > { %v1534_v35 = vpack.c.bf16 %v1530_v34, %v1529_v33  ;;  %v4530_v47 = vld [vmem:[%s5913_s18] ss:$0 sm:$0xff] }
  0x86   : > { %4697 = vmatpush3.bf16.msra.mxu0 %v1429_v6  ;;  %v4531_v51 = vld [vmem:[%s5914_s26] ss:$0 sm:$0xff] }
  0x87   : > { %4698 = vmatprep.subr.bf16.mxu0 %v5076_v3  ;;  %4705 = vmatpush3.bf16.msra.mxu1 %v1534_v35  ;;  %v4532_v56 = vld [vmem:[%s5915_s1] ss:$0 sm:$0xff] }
  0x88   : > { %4706 = vmatprep.subr.bf16.mxu1 %v5076_v3 }
  0x8a   : > { %4699 = vmatpush3.bf16.msra.mxu0 %v1430_v9 }
  0x8b   : > { %4707 = vmatpush3.bf16.msra.mxu1 %v1535_v38 }
  0x8d   : > { %4701 = vmatmul.mubr.msk.bf16.vlgmr.msra.gmra.mrb[0].mxu0 %vm1438_vm1, %v1427_v12 }
 0x160   : > { %v1476_v15 = vpop.f32.mrb[0].mxu0 }
 0x161   : > { %v1477_v16 = vadd.f32 %v4528_v14, %v1476_v15  ;;  %v4702_v17 = vpop.f32.mrb[1].mxu0 }
 0x162   : > { %v1479_v18 = vpop.f32.mrb[2].mxu0 }
 0x163   : > { %v1480_v19 = vadd.f32 %v4528_v14, %v1479_v18  ;;  %v4703_v20 = vpop.f32.mrb[3].mxu0  ;;  %v1486_v21 = vsel %vm1485_vm2, %v1477_v16, 0.0 }
 0x164   : > { %1487 = vadd.xlane.f32.xlu0 %v1486_v21 }
 0x165   : > { %v1489_v22 = vsel %vm1485_vm2, %v1480_v19, 0.0 }
 0x168   : > { %1490 = vadd.xlane.f32.xlu0 %v1489_v22 }
 0x1f1   : > { %v1488_v23 = vpop.xlane.xlu0 %1487 }
 0x1f2   : > { %v1493_v24 = vmul.f32 0.03125, %v1488_v23 }
 0x1f4   : > { %v1495_v25 = vsub.f32 %v1477_v16, %v1493_v24 }
 0x1f5   : > { %v1491_v26 = vpop.xlane.xlu0 %1490 }
 0x1f6   : > { %v1494_v27 = vmul.f32 0.03125, %v1491_v26  ;;  %v1497_v28 = vmul.f32 %v1495_v25, %v1495_v25 }
 0x1f8   : > { %v1496_v29 = vsub.f32 %v1480_v19, %v1494_v27  ;;  %v1499_v30 = vsel %vm1485_vm2, %v1497_v28, 0.0 }
 0x1f9   : > { %1500 = vadd.xlane.f32.xlu1 %v1499_v30 }
 0x1fa   : > { %v1498_v31 = vmul.f32 %v1496_v29, %v1496_v29 }
 0x1fc   : > { %v1502_v32 = vsel %vm1485_vm2, %v1498_v31, 0.0 }
 0x1fd   : > { %1503 = vadd.xlane.f32.xlu1 %v1502_v32 }
 0x286   : > { %v1501_v39 = vpop.xlane.xlu1 %1500 }
 0x287   : > { %v1505_v40 = vmul.f32 0.03125, %v1501_v39 }
 0x289   : > { %v1507_v41 = vadd.f32 1e-05, %v1505_v40 }
 0x28a   : > { %v1504_v42 = vpop.xlane.xlu1 %1503 }
 0x28b   : > { %4970 = vrsqrt.f32 %v1507_v41  ;;  %v1506_v43 = vmul.f32 0.03125, %v1504_v42 }
 0x28d   : > { %v1508_v44 = vadd.f32 1e-05, %v1506_v43 }
 0x28f   : > { %4972 = vrsqrt.f32 %v1508_v44 }
 0x295   : > { %v4971_v45 = vpop.eup %4970 }
 0x296   : > { %v1511_v46 = vmul.f32 %v4971_v45, %v1495_v25 }
 0x298   : > { %v1519_v50 = vmul.f32 %v4530_v47, %v1511_v46 }
 0x299   : > { %v4973_v48 = vpop.eup %4972 }
 0x29a   : > { %v1512_v49 = vmul.f32 %v4973_v48, %v1496_v29  ;;  %v1527_v53 = vadd.f32 %v4531_v51, %v1519_v50 }
 0x29c   : > { %v1520_v52 = vmul.f32 %v4530_v47, %v1512_v49 }
 0x29e   : > { %v1528_v54 = vadd.f32 %v4531_v51, %v1520_v52 }
 0x2a0   : > { %v1533_v55 = vpack.c.bf16 %v1528_v54, %v1527_v53 }
 0x2a2   : > { %4709 = vmatmul.mubr.msk.bf16.vlgmr.msra.gmra.mrb[0].mxu1 %vm1485_vm2, %v1533_v55 }
 0x375   : > { %v1580_v57 = vpop.f32.mrb[0].mxu1 }
 0x376   : > { %v1581_v58 = vadd.f32 %v4532_v56, %v1580_v57  ;;  %v4710_v59 = vpop.f32.mrb[1].mxu1 }
 0x377   : > { %v1583_v60 = vpop.f32.mrb[2].mxu1 }
 0x378   : > { %v1587_v61 = vmul.f32 %v1581_v58, %v1581_v58  ;;  %v1584_v62 = vadd.f32 %v4532_v56, %v1583_v60  ;;  %v4711_v63 = vpop.f32.mrb[3].mxu1 }
 0x37a   : > { %v1589_v0 = vmul.f32 %v1587_v61, %v1581_v58  ;;  %v1588_v1 = vmul.f32 %v1584_v62, %v1584_v62 }
 0x37c   : > { %v1591_v2 = vmul.f32 0.044715, %v1589_v0  ;;  %v1590_v3 = vmul.f32 %v1588_v1, %v1584_v62 }
 0x37e   : > { %v1593_v4 = vadd.f32 %v1591_v2, %v1581_v58  ;;  %v1592_v5 = vmul.f32 0.044715, %v1590_v3 }
 0x380   : > { %v1595_v6 = vmul.f32 0.7978846, %v1593_v4  ;;  %v1594_v7 = vadd.f32 %v1592_v5, %v1584_v62 }
 0x382   : > { %4974 = vtanh.f32 %v1595_v6  ;;  %v1596_v8 = vmul.f32 0.7978846, %v1594_v7 }
 0x384   : > { %4976 = vtanh.f32 %v1596_v8 }
 0x38c   : > { %v4975_v9 = vpop.eup %4974 }
 0x38d   : > { %v1599_v10 = vadd.f32 1.0, %v4975_v9 }
 0x38e   : > { %v4977_v11 = vpop.eup %4976 }
 0x38f   : > { %v1601_v12 = vmul.f32 0.5, %v1599_v10  ;;  %v1600_v13 = vadd.f32 1.0, %v4977_v11 }
 0x391   : > { %v1602_v14 = vmul.f32 0.5, %v1600_v13  ;;  %v1603_v15 = vmul.f32 %v1601_v12, %v1581_v58 }
 0x393   : > { %v1604_v16 = vmul.f32 %v1602_v14, %v1584_v62 }
 0x395   : > { %v1605_v17 = vpack.c.bf16 %v1604_v16, %v1603_v15 }
 0x397   : > { %1606 = vst.msk [vmem:[#allocation3] sm:$0xff] %vm1485_vm2, %v1605_v17 }
 0x398 PF: > { %s5916_s11 = sld [smem:[#allocation41_spill]]  ;;  %v5078_v21 = vmov 0.0   ;;  %s5917_s6 = sld [smem:[#allocation12_spill]]  ;;  %vm5079_vm3 = vmmov 0   ;;  %v5412_v29 = vld [vmem:[#allocation2] sm:$0xff]  ;;  %vm1627_vm4 = vcmask 261120   ;;  %v1795_v59 = vlaneseq }
 0x399   : > { %4712 = vmatprep.subr.bf16.mxu0 %v5078_v21  ;;  %4720 = vmatprep.subr.bf16.mxu1 %v5078_v21  ;;  %s5918_s5 = sld [smem:[#allocation43_spill]]  ;;  %s5080_s7 = smov 112   ;;  %v5081_v57 = vmov 1983009808   ;;  %v5082_v62 = vmov 1934713408  }
 0x39a   : > { %4716 = vmatprep.mubr.msk.bf16.mxu0 %vm5079_vm3, %v5078_v21  ;;  %4724 = vmatprep.mubr.msk.bf16.mxu1 %vm5079_vm3, %v5078_v21  ;;  %v1793_v58 = vunpack.c.l.s4 %v5081_v57  ;;  %v1796_v61 = vshrl.u32 %v1795_v59, 7  ;;  %v1824_v63 = vunpack.c.l.s4 %v5082_v62  ;;  %vm2391_vm5 = vcmask 130048   ;;  %s5919_s10 = sld [smem:[#allocation42_spill]]  ;;  %s5920_s18 = sld [smem:[#allocation16_spill]] }
 0x39b   : > { %s5083_s26 = smov 16   ;;  %vm3434_vm6 = vcmask 64512   ;;  %vm3464_vm7 = vcmask 1043456   ;;  %vm3840_vm8 = vcmask 523264  }
 0x39c   : > { %v1794_v60 = vunpack.c.0.s8 %v1793_v58  ;;  %v1825_v2 = vunpack.c.0.s8 %v1824_v63 }
 0x39e   : > { %v1613_v18 = vld [vmem:[%s5916_s11] sm:$0xff]  ;;  %v1614_v19 = vld [vmem:[%s5916_s11 + $0x8] sm:$0xff]  ;;  %v1615_v24 = vld [vmem:[%s5916_s11 + $0x10] sm:$0xff]  ;;  %v5446_v0 = vsub.s32 %v1794_v60, %v1796_v61  ;;  %v5456_v12 = vsub.s32 %v1825_v2, %v1796_v61 }
 0x39f   : > { %v4536_v20 = vld [vmem:[%s5916_s11 + $0x20] sm:$0xff]  ;;  %v1618_v22 = vpack.c.bf16 %v1614_v19, %v1613_v18  ;;  %v4537_v23 = vld [vmem:[%s5916_s11 + $0x28] sm:$0xff]  ;;  %v1616_v25 = vld [vmem:[%s5916_s11 + $0x18] sm:$0xff] }
 0x3a0   : > { %v1676_v26 = vpack.c.bf16 %v4537_v23, %v4536_v20  ;;  %v4538_v27 = vld [vmem:[%s5916_s11 + $0x30] sm:$0xff]  ;;  %v4539_v28 = vld [vmem:[%s5916_s11 + $0x38] sm:$0xff]  ;;  %v1619_v30 = vpack.c.bf16 %v1616_v25, %v1615_v24  ;;  %v5415_v31 = vld [vmem:[%s5917_s6] sm:$0xff]  ;;  %s5921_s1 = scalar_lea.vmem %s5920_s18, %s5312_s15  ;;  %s5923_s6 = sld [smem:[#allocation17_spill]] }
 0x3a1   : > { %4713 = vmatpush3.bf16.msra.mxu0 %v1618_v22  ;;  %v1611_v32 = vld [vmem:[#allocation3] sm:$0xff]  ;;  %v1677_v33 = vpack.c.bf16 %v4539_v28, %v4538_v27  ;;  %v1612_v34 = vadd.f32 %v5415_v31, %v5412_v29  ;;  %v4534_v37 = vld [vmem:[%s5918_s5] ss:$0 sm:$0xff]  ;;  %v4541_v38 = vld [vmem:[%s5918_s5 + $0x1] ss:$0 sm:$0xff] }
 0x3a2   : > { %4721 = vmatpush3.bf16.msra.mxu1 %v1676_v26  ;;  %4714 = vmatprep.subr.bf16.mxu0 %v5078_v21  ;;  %v5421_v35 = vsel %vm1627_vm4, %v1611_v32, 0  ;;  %v4543_v51 = vld [vmem:[%s5916_s11 + $0x40] sm:$0xff]  ;;  %v4544_v52 = vld [vmem:[%s5916_s11 + $0x48] sm:$0xff]  ;;  %v4545_v54 = vld [vmem:[%s5916_s11 + $0x50] sm:$0xff] }
 0x3a3   : > { %4722 = vmatprep.subr.bf16.mxu1 %v5078_v21  ;;  %v1617_v36 = vpack.c.bf16 %v1612_v34, %v1612_v34  ;;  %v1735_v53 = vpack.c.bf16 %v4544_v52, %v4543_v51  ;;  %v4546_v55 = vld [vmem:[%s5916_s11 + $0x58] sm:$0xff]  ;;  %s5922_s11 = sld [smem:[#allocation44_spill]] }
 0x3a4   : > { %v1736_v56 = vpack.c.bf16 %v4546_v55, %v4545_v54 }
 0x3a5   : > { %4715 = vmatpush3.bf16.msra.mxu0 %v1619_v30 }
 0x3a6   : > { %4723 = vmatpush3.bf16.msra.mxu1 %v1677_v33  ;;  %4728 = vmatprep.subr.bf16.mxu0 %v5078_v21 }
 0x3a7   : > { %4736 = vmatprep.subr.bf16.mxu1 %v5078_v21 }
 0x3a8   : > { %4717 = vmatmul.mubr.msk.bf16.vlgmr.msra.gmra.mrb[0].mxu0 %vm1627_vm4, %v1617_v36 }
 0x3a9   : > { %4725 = vmatmul.mubr.msk.bf16.vlgmr.msra.gmra.mrb[0].mxu1 %vm1627_vm4, %v1611_v32  ;;  %4732 = vmatprep.mubr.msk.bf16.mxu0 %vm5079_vm3, %v5078_v21 }
 0x3aa   : > { %4738 = vmatprep.mubr.msk.bf16.mxu1 %vm5079_vm3, %v5078_v21  ;;  %4729 = vmatpush3.bf16.msra.mxu0 %v1735_v53 }
 0x3ab   : > { %4730 = vmatprep.subr.bf16.mxu0 %v5078_v21 }
 0x3ae   : > { %4731 = vmatpush3.bf16.msra.mxu0 %v1736_v56 }
 0x3af   : > { %4742 = vmatprep.subr.bf16.mxu0 %v5078_v21 }
 0x3b1   : > { %4733 = vmatmul.mubr.msk.bf16.vlgmr.msra.gmra.mrb[4].mxu0 %vm1627_vm4, %v1611_v32 }
 0x3b2   : > { %4744 = vmatprep.mubr.msk.bf16.mxu0 %vm5079_vm3, %v5078_v21 }
 0x47b   : > { %v1665_v39 = vpop.f32.mrb[0].mxu0 }
 0x47c   : > { %v1666_v40 = vadd.f32 %v4534_v37, %v1665_v39  ;;  %v1723_v41 = vpop.f32.mrb[0].mxu1  ;;  %v4718_v42 = vpop.f32.mrb[1].mxu0 }
 0x47d   : > { %v1724_v43 = vadd.f32 %v4541_v38, %v1723_v41  ;;  %v4726_v44 = vpop.f32.mrb[1].mxu1  ;;  %v1668_v45 = vpop.f32.mrb[2].mxu0 }
 0x47e   : > { %v1786_v46 = vmul.f32 0.25, %v1666_v40  ;;  %v1726_v47 = vpop.f32.mrb[2].mxu1  ;;  %v4719_v48 = vpop.f32.mrb[3].mxu0 }
 0x47f   : > { %1909 = vrot.lane.b32.xlu0 %v1724_v43, %s5080_s7  ;;  %v4727_v49 = vpop.f32.mrb[3].mxu1  ;;  %v1727_v50 = vadd.f32 %v4541_v38, %v1726_v47  ;;  %v1915_v1 = vcombine.high %v1724_v43, %v5078_v21  ;;  %v1922_v8 = vrot.slane %v1724_v43, %v5446_v0 }
 0x480   : > { %1788 = vrot.lane.b32.xlu1 %v1786_v46, %s5080_s7  ;;  %v1791_v7 = vcombine.high %v1786_v46, %v5078_v21  ;;  %v1798_v20 = vrot.slane %v1786_v46, %v5446_v0 }
 0x481   : > { %v1929_v10 = vrot.slane %v1915_v1, %v5446_v0  ;;  %v1981_v30 = vcombine.high %v1727_v50, %v5078_v21  ;;  %v1988_v37 = vrot.slane %v1727_v50, %v5446_v0 }
 0x482   : > { %v1805_v18 = vrot.slane %v1791_v7, %v5446_v0 }
 0x483   : > { %1911 = vrot.lane.b32.xlu0 %v1727_v50, %s5080_s7  ;;  %v1995_v44 = vrot.slane %v1981_v30, %v5446_v0 }
 0x4f1   : > { %v1910_v3 = vpop.permute.xlu0 %1909 }
 0x4f2   : > { %v1930_v4 = vcombine.high %v1910_v3, %v5078_v21  ;;  %v1937_v5 = vrot.slane %v1910_v3, %v5446_v0  ;;  %v1789_v6 = vpop.permute.xlu1 %1788 }
 0x4f3   : > { %v1806_v9 = vcombine.high %v1789_v6, %v5078_v21  ;;  %v1813_v19 = vrot.slane %v1789_v6, %v5446_v0 }
 0x4f4   : > { %v1944_v11 = vrot.slane %v1930_v4, %v5446_v0  ;;  %v1945_v13 = vcombine.low %v1922_v8, %v1937_v5  ;;  %v1946_v14 = vcombine.high %v1922_v8, %v1937_v5 }
 0x4f5   : > { %v1820_v15 = vrot.slane %v1806_v9, %v5446_v0  ;;  %v1912_v28 = vpop.permute.xlu0 %1911  ;;  %v1821_v34 = vcombine.low %v1798_v20, %v1813_v19  ;;  %v1822_v36 = vcombine.high %v1798_v20, %v1813_v19 }
 0x4f6   : > { %v1961_v16 = vcombine.low %v1929_v10, %v1944_v11  ;;  %v1962_v17 = vcombine.high %v1929_v10, %v1944_v11  ;;  %v1953_v24 = vrot.slane %v1945_v13, %v5456_v12  ;;  %v1960_v25 = vrot.slane %v1946_v14, %v5456_v12 }
 0x4f7   : > { %v1837_v26 = vcombine.low %v1805_v18, %v1820_v15  ;;  %v1838_v27 = vcombine.high %v1805_v18, %v1820_v15  ;;  %v1996_v38 = vcombine.high %v1912_v28, %v5078_v21  ;;  %v2003_v39 = vrot.slane %v1912_v28, %v5446_v0 }
 0x4f8   : > { %v1969_v22 = vrot.slane %v1961_v16, %v5456_v12  ;;  %v1976_v23 = vrot.slane %v1962_v17, %v5456_v12  ;;  %v2047_v40 = vcombine.low %v1953_v24, %v1960_v25  ;;  %v4552_v41 = vcombine.high %v1953_v24, %v1960_v25 }
 0x4f9   : > { %v1845_v42 = vrot.slane %v1837_v26, %v5456_v12  ;;  %v1852_v43 = vrot.slane %v1838_v27, %v5456_v12  ;;  %v2010_v45 = vrot.slane %v1996_v38, %v5446_v0  ;;  %v2011_v46 = vcombine.low %v1988_v37, %v2003_v39 }
 0x4fa   : > { %v2063_v32 = vcombine.low %v1969_v22, %v1976_v23  ;;  %v4553_v33 = vcombine.high %v1969_v22, %v1976_v23  ;;  %v2012_v47 = vcombine.high %v1988_v37, %v2003_v39  ;;  %v1829_v50 = vrot.slane %v1821_v34, %v5456_v12 }
 0x4fb   : > { %v1836_v51 = vrot.slane %v1822_v36, %v5456_v12  ;;  %v2019_v52 = vrot.slane %v2011_v46, %v5456_v12  ;;  %v2027_v54 = vcombine.low %v1995_v44, %v2010_v45  ;;  %v2028_v55 = vcombine.high %v1995_v44, %v2010_v45 }
 0x4fc   : > { %v2070_v48 = vrot.slane %v2063_v32, %v5446_v0  ;;  %v2078_v49 = vrot.slane %v4553_v33, %v5446_v0  ;;  %v2026_v53 = vrot.slane %v2012_v47, %v5456_v12  ;;  %v2054_v56 = vrot.slane %v2047_v40, %v5446_v0 }
 0x4fd   : > { %v2062_v57 = vrot.slane %v4552_v41, %v5446_v0  ;;  %v1873_v58 = vcombine.low %v1845_v42, %v1852_v43  ;;  %v4551_v59 = vcombine.high %v1845_v42, %v1852_v43  ;;  %v2035_v60 = vrot.slane %v2027_v54, %v5456_v12  ;;  %v1779_v42 = vpop.f32.mrb[4].mxu0 }
 0x4fe   : > { %v2042_v61 = vrot.slane %v2028_v55, %v5456_v12  ;;  %v2097_v62 = vcombine.low %v2019_v52, %v2026_v53  ;;  %v4554_v63 = vcombine.high %v2019_v52, %v2026_v53  ;;  %v1857_v1 = vcombine.low %v1829_v50, %v1836_v51  ;;  %v4734_v43 = vpop.f32.mrb[5].mxu0 }
 0x4ff   : > { %v4550_v2 = vcombine.high %v1829_v50, %v1836_v51  ;;  %v2087_v3 = vcombine.low %v2070_v48, %v2078_v49  ;;  %v1880_v8 = vrot.slane %v1873_v58, %v5446_v0  ;;  %v1888_v9 = vrot.slane %v4551_v59, %v5446_v0  ;;  %v1782_v44 = vpop.f32.mrb[6].mxu0 }
 0x500   : > { %v2104_v4 = vrot.slane %v2097_v62, %v5446_v0  ;;  %v2112_v5 = vrot.slane %v4554_v63, %v5446_v0  ;;  %v2113_v6 = vcombine.low %v2035_v60, %v2042_v61  ;;  %v4555_v7 = vcombine.high %v2035_v60, %v2042_v61  ;;  %v4735_v45 = vpop.f32.mrb[7].mxu0 }
 0x501   : > { %v2079_v13 = vcombine.low %v2054_v56, %v2062_v57  ;;  %v1864_v15 = vrot.slane %v1857_v1, %v5446_v0  ;;  %v1872_v16 = vrot.slane %v4550_v2, %v5446_v0  ;;  %v2094_v17 = vrot.slane %v2087_v3, %v5456_v12  ;;  %v4548_v3 = vld [vmem:[%s5918_s5 + $0x2] ss:$0 sm:$0xff]  ;;  %s5924_s5 = sld [smem:[#allocation18_spill]] }
 0x502   : > { %v2120_v10 = vrot.slane %v2113_v6, %v5446_v0  ;;  %v2128_v11 = vrot.slane %v4555_v7, %v5446_v0  ;;  %v2129_v14 = vcombine.low %v2104_v4, %v2112_v5  ;;  %v1897_v19 = vcombine.low %v1880_v8, %v1888_v9 }
 0x503   : > { %v2086_v20 = vrot.slane %v2079_v13, %v5456_v12  ;;  %v1889_v24 = vcombine.low %v1864_v15, %v1872_v16  ;;  %v1783_v4 = vadd.f32 %v4548_v3, %v1782_v44  ;;  %v1780_v5 = vadd.f32 %v4548_v3, %v1779_v42 }
 0x504   : > { %v2137_v18 = vcombine.low %v2120_v10, %v2128_v11  ;;  %v2136_v22 = vrot.slane %v2129_v14, %v5456_v12  ;;  %v1904_v33 = vrot.slane %v1897_v19, %v5456_v12 }
 0x505   : > { %v2095_v25 = vcombine.low %v2086_v20, %v2094_v17  ;;  %v2096_v27 = vcombine.high %v2086_v20, %v2094_v17  ;;  %v1896_v34 = vrot.slane %v1889_v24, %v5456_v12  ;;  %v2155_v7 = vcombine.high %v1780_v5, %v5078_v21 }
 0x506   : > { %v2144_v23 = vrot.slane %v2137_v18, %v5456_v12  ;;  %v2221_v9 = vcombine.high %v1783_v4, %v5078_v21  ;;  %v2162_v11 = vrot.slane %v1780_v5, %v5446_v0  ;;  %v2228_v17 = vrot.slane %v1783_v4, %v5446_v0 }
 0x507   : > { %v1905_v38 = vcombine.low %v1896_v34, %v1904_v33  ;;  %v1906_v39 = vcombine.high %v1896_v34, %v1904_v33  ;;  %v2169_v13 = vrot.slane %v2155_v7, %v5446_v0  ;;  %s5926_s18 = scalar_lea.vmem %s5924_s5, %s5312_s15 }
 0x508   : > { %v2145_v26 = vcombine.low %v2136_v22, %v2144_v23  ;;  %v2146_v28 = vcombine.high %v2136_v22, %v2144_v23  ;;  %v2235_v18 = vrot.slane %v2221_v9, %v5446_v0 }
 0x509   : > { %v2387_v40 = vpack.c.bf16 %v1905_v38, %v1905_v38  ;;  %v2388_v41 = vpack.c.bf16 %v1906_v39, %v1906_v39 }
 0x50a   : > { %v2389_v30 = vpack.c.bf16 %v2145_v26, %v2095_v25  ;;  %v2390_v32 = vpack.c.bf16 %v2146_v28, %v2096_v27 }
 0x50c   : > { %v2396_v36 = vsel %vm2391_vm5, %v2389_v30, 0  ;;  %v2442_v37 = vsel %vm2391_vm5, %v2390_v32, 0 }
 0x50d   : > { %4737 = vmatpush3.bf16.xpose.msra.mxu1 %v2396_v36  ;;  %4743 = vmatpush3.bf16.xpose.msra.mxu0 %v2442_v37 }
 0x50e   : > { %4748 = vmatprep.subr.bf16.mxu1 %v5078_v21  ;;  %4754 = vmatprep.subr.bf16.mxu0 %v5078_v21 }
 0x514   : > { %4739 = vmatmul.mubr.msk.bf16.vlgmr.msra.gmra.mrb[4].mxu1 %vm2391_vm5, %v2387_v40  ;;  %4745 = vmatmul.mubr.msk.bf16.vlgmr.msra.gmra.mrb[8].mxu0 %vm2391_vm5, %v2388_v41 }
 0x515   : > { %4750 = vmatprep.mubr.msk.bf16.mxu1 %vm5079_vm3, %v5078_v21  ;;  %4756 = vmatprep.mubr.msk.bf16.mxu0 %vm5079_vm3, %v5078_v21 }
 0x5e7   : > { %v2432_v46 = vpop.f32.mrb[4].mxu1  ;;  %v2478_v47 = vpop.f32.mrb[8].mxu0 }
 0x5e8   : > { %v4740_v48 = vpop.f32.mrb[5].mxu1  ;;  %v4746_v49 = vpop.f32.mrb[9].mxu0  ;;  %v2484_v50 = vsel %vm2391_vm5, %v2432_v46, -inf  ;;  %v2487_v51 = vsel %vm2391_vm5, %v2478_v47, -inf }
 0x5e9   : > { %2485 = vmax.xlane.f32.xlu1 %v2484_v50  ;;  %v2435_v52 = vpop.f32.mrb[6].mxu1  ;;  %2488 = vmax.xlane.f32.xlu0 %v2487_v51  ;;  %v2481_v53 = vpop.f32.mrb[10].mxu0 }
 0x5ea   : > { %v4741_v54 = vpop.f32.mrb[7].mxu1  ;;  %v4747_v55 = vpop.f32.mrb[11].mxu0 }
 0x676   : > { %v2486_v56 = vpop.xlane.xlu1 %2485  ;;  %v2489_v57 = vpop.xlane.xlu0 %2488 }
 0x677   : > { %v2490_v58 = vsub.f32 %v2432_v46, %v2486_v56  ;;  %v2491_v59 = vsub.f32 %v2478_v47, %v2489_v57 }
 0x679   : > { %v2492_v60 = vmul.f32 1.442695, %v2490_v58  ;;  %v2494_v61 = vmul.f32 1.442695, %v2491_v59 }
 0x67b   : > { %4978 = vpow2.f32 %v2492_v60 }
 0x67c   : > { %4980 = vpow2.f32 %v2494_v61 }
 0x685   : > { %v5510_v62 = vpop.eup %4978 }
 0x686   : > { %v5512_v63 = vpop.eup %4980  ;;  %v2496_v1 = vsel %vm2391_vm5, %v5510_v62, 0.0 }
 0x687   : > { %2497 = vadd.xlane.f32.xlu0 %v2496_v1  ;;  %v2499_v2 = vsel %vm2391_vm5, %v5512_v63, 0.0 }
 0x688   : > { %2500 = vadd.xlane.f32.xlu1 %v2499_v2 }
 0x699   : > { %2151 = vrot.lane.b32.xlu1 %v1783_v4, %s5080_s7 }
 0x69d   : > { %2149 = vrot.lane.b32.xlu0 %v1780_v5, %s5080_s7 }
 0x714   : > { %v2498_v6 = vpop.xlane.xlu0 %2497 }
 0x715   : > { %v2501_v8 = vpop.xlane.xlu1 %2500  ;;  %4982 = vrcp.f32 %v2498_v6 }
 0x716   : > { %4984 = vrcp.f32 %v2501_v8 }
 0x718   : > { %v2150_v10 = vpop.permute.xlu0 %2149 }
 0x719   : > { %v2152_v14 = vpop.permute.xlu1 %2151  ;;  %v2170_v15 = vcombine.high %v2150_v10, %v5078_v21  ;;  %v2177_v16 = vrot.slane %v2150_v10, %v5446_v0 }
 0x71a   : > { %v2236_v19 = vcombine.high %v2152_v14, %v5078_v21  ;;  %v2243_v20 = vrot.slane %v2152_v14, %v5446_v0 }
 0x71b   : > { %v2184_v22 = vrot.slane %v2170_v15, %v5446_v0  ;;  %v2185_v23 = vcombine.low %v2162_v11, %v2177_v16  ;;  %v2186_v24 = vcombine.high %v2162_v11, %v2177_v16 }
 0x71c   : > { %v2250_v25 = vrot.slane %v2236_v19, %v5446_v0  ;;  %v2251_v26 = vcombine.low %v2228_v17, %v2243_v20  ;;  %v2252_v27 = vcombine.high %v2228_v17, %v2243_v20 }
 0x71d   : > { %v2193_v28 = vrot.slane %v2185_v23, %v5456_v12  ;;  %v2200_v30 = vrot.slane %v2186_v24, %v5456_v12  ;;  %v2201_v32 = vcombine.low %v2169_v13, %v2184_v22  ;;  %v2202_v33 = vcombine.high %v2169_v13, %v2184_v22 }
 0x71e   : > { %v2259_v34 = vrot.slane %v2251_v26, %v5456_v12  ;;  %v2266_v36 = vrot.slane %v2252_v27, %v5456_v12  ;;  %v2267_v37 = vcombine.low %v2235_v18, %v2250_v25  ;;  %v2268_v38 = vcombine.high %v2235_v18, %v2250_v25 }
 0x71f   : > { %v2209_v39 = vrot.slane %v2201_v32, %v5456_v12  ;;  %v2216_v40 = vrot.slane %v2202_v33, %v5456_v12  ;;  %v2287_v41 = vcombine.low %v2193_v28, %v2200_v30  ;;  %v4556_v42 = vcombine.high %v2193_v28, %v2200_v30  ;;  %v4983_v58 = vpop.eup %4982 }
 0x720   : > { %v2275_v43 = vrot.slane %v2267_v37, %v5456_v12  ;;  %v2282_v44 = vrot.slane %v2268_v38, %v5456_v12  ;;  %v2337_v45 = vcombine.low %v2259_v34, %v2266_v36  ;;  %v4558_v46 = vcombine.high %v2259_v34, %v2266_v36  ;;  %v4985_v1 = vpop.eup %4984 }
 0x721   : > { %v2294_v47 = vrot.slane %v2287_v41, %v5446_v0  ;;  %v2302_v48 = vrot.slane %v4556_v42, %v5446_v0  ;;  %v2303_v52 = vcombine.low %v2209_v39, %v2216_v40  ;;  %v4557_v54 = vcombine.high %v2209_v39, %v2216_v40  ;;  %v2719_v40 = vld [vmem:[%s5919_s10 + $0x10] sm:$0xff]  ;;  %v2720_v41 = vld [vmem:[%s5919_s10 + $0x18] sm:$0xff] }
 0x722   : > { %v2344_v49 = vrot.slane %v2337_v45, %v5446_v0  ;;  %v2353_v50 = vcombine.low %v2275_v43, %v2282_v44  ;;  %v4559_v51 = vcombine.high %v2275_v43, %v2282_v44  ;;  %v2352_v53 = vrot.slane %v4558_v46, %v5446_v0 }
 0x723   : > { %v2310_v57 = vrot.slane %v2303_v52, %v5446_v0  ;;  %v2318_v60 = vrot.slane %v4557_v54, %v5446_v0  ;;  %v2319_v61 = vcombine.low %v2294_v47, %v2302_v48  ;;  %v2505_v13 = vmul.f32 %v4985_v1, %v5512_v63  ;;  %v2718_v63 = vld [vmem:[%s5919_s10 + $0x8] sm:$0xff] }
 0x724   : > { %v2360_v55 = vrot.slane %v2353_v50, %v5446_v0  ;;  %v2368_v56 = vrot.slane %v4559_v51, %v5446_v0  ;;  %v2369_v59 = vcombine.low %v2344_v49, %v2352_v53  ;;  %v2504_v14 = vmul.f32 %v4983_v58, %v5510_v62  ;;  %v2717_v62 = vld [vmem:[%s5919_s10] sm:$0xff]  ;;  %s5925_s10 = scalar_lea.vmem %s5923_s6, %s5312_s15 }
 0x725   : > { %v2327_v3 = vcombine.low %v2310_v57, %v2318_v60  ;;  %v2326_v6 = vrot.slane %v2319_v61, %v5456_v12  ;;  %v2507_v18 = vpack.c.bf16 %v2505_v13, %v2505_v13  ;;  %v2722_v19 = vpack.c.bf16 %v2718_v63, %v2717_v62  ;;  %v2806_v62 = vld [vmem:[%s5922_s11] sm:$0xff]  ;;  %v2807_v63 = vld [vmem:[%s5922_s11 + $0x8] sm:$0xff] }
 0x726   : > { %v2377_v2 = vcombine.low %v2360_v55, %v2368_v56  ;;  %v2376_v4 = vrot.slane %v2369_v59, %v5456_v12  ;;  %v2506_v17 = vpack.c.bf16 %v2504_v14, %v2504_v14  ;;  %v2723_v42 = vpack.c.bf16 %v2720_v41, %v2719_v40  ;;  %v4579_v41 = vld [vmem:[%s5922_s11 + $0x40] sm:$0xff] }
 0x727   : > { %v2334_v7 = vrot.slane %v2327_v3, %v5456_v12 }
 0x728   : > { %v2384_v5 = vrot.slane %v2377_v2, %v5456_v12 }
 0x729   : > { %v2335_v10 = vcombine.low %v2326_v6, %v2334_v7  ;;  %v2336_v11 = vcombine.high %v2326_v6, %v2334_v7 }
 0x72a   : > { %v2385_v8 = vcombine.low %v2376_v4, %v2384_v5  ;;  %v2386_v9 = vcombine.high %v2376_v4, %v2384_v5  ;;  %v4566_v5 = vld [vmem:[%s5921_s1] ss:$0 sm:$0xff] }
 0x72c   : > { %v2508_v15 = vpack.c.bf16 %v2385_v8, %v2335_v10  ;;  %v2509_v16 = vpack.c.bf16 %v2386_v9, %v2336_v11 }
 0x72e   : > { %4749 = vmatpush3.bf16.msra.mxu1 %v2508_v15  ;;  %4755 = vmatpush3.bf16.msra.mxu0 %v2509_v16 }
 0x72f   : > { %4760 = vmatprep.subr.bf16.mxu1 %v5078_v21  ;;  %4768 = vmatprep.subr.bf16.mxu0 %v5078_v21 }
 0x731   : > { %4751 = vmatmul.mubr.msk.bf16.vlgmr.msra.gmra.mrb[8].mxu1 %vm2391_vm5, %v2506_v17  ;;  %4757 = vmatmul.mubr.msk.bf16.vlgmr.msra.gmra.mrb[12].mxu0 %vm2391_vm5, %v2507_v18 }
 0x732   : > { %4764 = vmatprep.mubr.msk.bf16.mxu1 %vm5079_vm3, %v5078_v21  ;;  %4772 = vmatprep.mubr.msk.bf16.mxu0 %vm5079_vm3, %v5078_v21 }
 0x733   : > { %4761 = vmatpush3.bf16.msra.mxu1 %v2722_v19  ;;  %v4572_v19 = vld [vmem:[%s5922_s11 + $0x20] sm:$0xff] }
 0x734   : > { %4762 = vmatprep.subr.bf16.mxu1 %v5078_v21 }
 0x737   : > { %4763 = vmatpush3.bf16.msra.mxu1 %v2723_v42  ;;  %v4580_v42 = vld [vmem:[%s5922_s11 + $0x48] sm:$0xff] }
 0x738   : > { %4776 = vmatprep.subr.bf16.mxu1 %v5078_v21 }
 0x804   : > { %v2547_v20 = vpop.f32.mrb[8].mxu1  ;;  %v2590_v22 = vpop.f32.mrb[12].mxu0 }
 0x805   : > { %v2596_v23 = vcombine.high %v2547_v20, %v5078_v21  ;;  %v2603_v24 = vrot.slane %v2547_v20, %v5446_v0  ;;  %v2611_v25 = vcombine.high %v2590_v22, %v5078_v21  ;;  %v2618_v26 = vrot.slane %v2590_v22, %v5446_v0  ;;  %v4752_v27 = vpop.f32.mrb[9].mxu1  ;;  %v4758_v28 = vpop.f32.mrb[13].mxu0  ;;  %v4573_v22 = vld [vmem:[%s5922_s11 + $0x28] sm:$0xff] }
 0x806   : > { %v2550_v30 = vpop.f32.mrb[10].mxu1  ;;  %v2593_v32 = vpop.f32.mrb[14].mxu0  ;;  %v2811_v20 = vpack.c.bf16 %v2807_v63, %v2806_v62  ;;  %v4575_v27 = vld [vmem:[%s5922_s11 + $0x38] sm:$0xff] }
 0x807   : > { %v2610_v33 = vrot.slane %v2596_v23, %v5446_v0  ;;  %v2625_v34 = vrot.slane %v2611_v25, %v5446_v0  ;;  %v2626_v36 = vcombine.low %v2603_v24, %v2618_v26  ;;  %v2627_v37 = vcombine.high %v2603_v24, %v2618_v26  ;;  %v4753_v38 = vpop.f32.mrb[11].mxu1  ;;  %v4759_v39 = vpop.f32.mrb[15].mxu0  ;;  %v2808_v23 = vld [vmem:[%s5922_s11 + $0x10] sm:$0xff]  ;;  %v2809_v24 = vld [vmem:[%s5922_s11 + $0x18] sm:$0xff] }
 0x808   : > { %4769 = vmatpush3.bf16.msra.mxu0 %v2811_v20  ;;  %v4574_v25 = vld [vmem:[%s5922_s11 + $0x30] sm:$0xff]  ;;  %v2812_v26 = vpack.c.bf16 %v2809_v24, %v2808_v23  ;;  %v4569_v38 = vld [vmem:[%s5926_s18] ss:$0 sm:$0xff] }
 0x809   : > { %v2634_v43 = vrot.slane %v2626_v36, %v5456_v12  ;;  %v2641_v44 = vrot.slane %v2627_v37, %v5456_v12  ;;  %v2642_v45 = vcombine.low %v2610_v33, %v2625_v34  ;;  %v2643_v46 = vcombine.high %v2610_v33, %v2625_v34  ;;  %4770 = vmatprep.subr.bf16.mxu0 %v5078_v21  ;;  %v4568_v36 = vld [vmem:[%s5925_s10] ss:$0 sm:$0xff] }
 0x80a   : > { %v2869_v28 = vpack.c.bf16 %v4575_v27, %v4574_v25 }
 0x80b   : > { %v2650_v47 = vrot.slane %v2642_v45, %v5456_v12  ;;  %v2657_v48 = vrot.slane %v2643_v46, %v5456_v12  ;;  %v2662_v49 = vcombine.low %v2634_v43, %v2641_v44  ;;  %v4564_v50 = vcombine.high %v2634_v43, %v2641_v44  ;;  %v4581_v46 = vld [vmem:[%s5922_s11 + $0x50] sm:$0xff] }
 0x80c   : > { %4771 = vmatpush3.bf16.msra.mxu0 %v2812_v26  ;;  %v2924_v44 = vpack.c.bf16 %v4580_v42, %v4579_v41 }
 0x80d   : > { %v2669_v51 = vrot.slane %v2662_v49, %v5446_v0  ;;  %v2677_v52 = vrot.slane %v4564_v50, %v5446_v0  ;;  %v2678_v53 = vcombine.low %v2650_v47, %v2657_v48  ;;  %v4565_v54 = vcombine.high %v2650_v47, %v2657_v48  ;;  %4784 = vmatprep.subr.bf16.mxu0 %v5078_v21  ;;  %v4582_v47 = vld [vmem:[%s5922_s11 + $0x58] sm:$0xff]  ;;  %v4570_v49 = vld [vmem:[%s5341_s2] ss:$0 sm:$0xff]  ;;  %v4577_v50 = vld [vmem:[%s5341_s2 + $0x1] ss:$0 sm:$0xff] }
 0x80e   : > { %v2925_v48 = vpack.c.bf16 %v4582_v47, %v4581_v46 }
 0x80f   : > { %v2685_v55 = vrot.slane %v2678_v53, %v5446_v0  ;;  %v2693_v56 = vrot.slane %v4565_v54, %v5446_v0  ;;  %v2694_v57 = vcombine.low %v2669_v51, %v2677_v52 }
 0x811   : > { %v2702_v58 = vcombine.low %v2685_v55, %v2693_v56  ;;  %v2701_v59 = vrot.slane %v2694_v57, %v5456_v12 }
 0x813   : > { %v2709_v60 = vrot.slane %v2702_v58, %v5456_v12 }
 0x815   : > { %v2711_v61 = vcombine.high %v2701_v59, %v2709_v60  ;;  %v2710_v1 = vcombine.low %v2701_v59, %v2709_v60 }
 0x817   : > { %2713 = vrot.lane.b32.xlu1 %v2711_v61, %s5083_s26 }
 0x889   : > { %v2714_v2 = vpop.permute.xlu1 %2713 }
 0x88a   : > { %v2716_v3 = vsel %vm2391_vm5, %v2710_v1, %v2714_v2 }
 0x88b   : > { %v2721_v4 = vpack.c.bf16 %v2716_v3, %v2716_v3 }
 0x88d   : > { %4765 = vmatmul.mubr.msk.bf16.vlgmr.msra.gmra.mrb[12].mxu1 %vm1627_vm4, %v2721_v4 }
 0x88e   : > { %4780 = vmatprep.mubr.msk.bf16.mxu1 %vm5079_vm3, %v5078_v21 }
 0x960   : > { %v2768_v6 = vpop.f32.mrb[12].mxu1 }
 0x961   : > { %v2769_v7 = vadd.f32 %v4566_v5, %v2768_v6  ;;  %v4766_v8 = vpop.f32.mrb[13].mxu1 }
 0x962   : > { %v2771_v9 = vpop.f32.mrb[14].mxu1 }
 0x963   : > { %v4767_v10 = vpop.f32.mrb[15].mxu1  ;;  %v2774_v11 = vadd.f32 %v2769_v7, %v5412_v29  ;;  %v2868_v29 = vpack.c.bf16 %v4573_v22, %v4572_v19 }
 0x965   : > { %v2777_v13 = vsel %vm1627_vm4, %v2774_v11, 0.0  ;;  %4777 = vmatpush3.bf16.msra.mxu1 %v2868_v29 }
 0x966   : > { %2778 = vadd.xlane.f32.xlu0 %v2777_v13  ;;  %4778 = vmatprep.subr.bf16.mxu1 %v5078_v21 }
 0x969   : > { %4779 = vmatpush3.bf16.msra.mxu1 %v2869_v28 }
 0x96a   : > { %4792 = vmatprep.subr.bf16.mxu1 %v5078_v21 }
 0x9f3   : > { %v2779_v14 = vpop.xlane.xlu0 %2778 }
 0x9f4   : > { %v2781_v15 = vmul.f32 0.03125, %v2779_v14 }
 0x9f6   : > { %v2782_v16 = vsub.f32 %v2774_v11, %v2781_v15 }
 0x9f8   : > { %v2783_v17 = vmul.f32 %v2782_v16, %v2782_v16 }
 0x9fa   : > { %v2784_v18 = vsel %vm1627_vm4, %v2783_v17, 0.0 }
 0x9fb   : > { %2785 = vadd.xlane.f32.xlu1 %v2784_v18 }
 0xa88   : > { %v2786_v30 = vpop.xlane.xlu1 %2785 }
 0xa89   : > { %v2787_v32 = vmul.f32 0.03125, %v2786_v30 }
 0xa8b   : > { %v2788_v33 = vadd.f32 1e-05, %v2787_v32 }
 0xa8d   : > { %4986 = vrsqrt.f32 %v2788_v33 }
 0xa97   : > { %v4987_v34 = vpop.eup %4986 }
 0xa98   : > { %v2790_v37 = vmul.f32 %v4987_v34, %v2782_v16 }
 0xa9a   : > { %v2797_v39 = vmul.f32 %v4568_v36, %v2790_v37 }
 0xa9c   : > { %v5614_v40 = vadd.f32 %v4569_v38, %v2797_v39 }
 0xa9e   : > { %v2805_v43 = vadd.f32 %v5614_v40, %v5415_v31  ;;  %v2923_v31 = vpack.c.bf16 %v5614_v40, %v5614_v40 }
 0xaa0   : > { %v2810_v45 = vpack.c.bf16 %v2805_v43, %v2805_v43 }
 0xaa2   : > { %4773 = vmatmul.mubr.msk.bf16.vlgmr.msra.gmra.mrb[16].mxu0 %vm1627_vm4, %v2810_v45  ;;  %4781 = vmatmul.mubr.msk.bf16.vlgmr.msra.gmra.mrb[16].mxu1 %vm1627_vm4, %v2810_v45 }
 0xaa3   : > { %4785 = vmatpush3.bf16.msra.mxu0 %v2924_v44  ;;  %4788 = vmatprep.mubr.msk.bf16.mxu0 %vm5079_vm3, %v5078_v21 }
 0xaa4   : > { %4786 = vmatprep.subr.bf16.mxu0 %v5078_v21  ;;  %4794 = vmatprep.mubr.msk.bf16.mxu1 %vm5079_vm3, %v5078_v21 }
 0xaa7   : > { %4787 = vmatpush3.bf16.msra.mxu0 %v2925_v48 }
 0xaa8   : > { %4798 = vmatprep.subr.bf16.mxu0 %v5078_v21 }
 0xaaa   : > { %4789 = vmatmul.mubr.msk.bf16.vlgmr.msra.gmra.mrb[20].mxu0 %vm1627_vm4, %v2923_v31 }
 0xaab   : > { %4800 = vmatprep.mubr.msk.bf16.mxu0 %vm5079_vm3, %v5078_v21 }
 0xb75   : > { %v2857_v51 = vpop.f32.mrb[16].mxu0  ;;  %v2912_v52 = vpop.f32.mrb[16].mxu1 }
 0xb76   : > { %v2858_v53 = vadd.f32 %v4570_v49, %v2857_v51  ;;  %v2913_v54 = vadd.f32 %v4577_v50, %v2912_v52  ;;  %v4774_v55 = vpop.f32.mrb[17].mxu0  ;;  %v4782_v56 = vpop.f32.mrb[17].mxu1 }
 0xb77   : > { %v2860_v57 = vpop.f32.mrb[18].mxu0  ;;  %v2915_v58 = vpop.f32.mrb[18].mxu1 }
 0xb78   : > { %v2977_v59 = vmul.f32 0.25, %v2858_v53  ;;  %3099 = vrot.lane.b32.xlu0 %v2913_v54, %s5080_s7  ;;  %v4775_v60 = vpop.f32.mrb[19].mxu0  ;;  %v4783_v61 = vpop.f32.mrb[19].mxu1  ;;  %v3102_v5 = vcombine.high %v2913_v54, %v5078_v21  ;;  %v3109_v7 = vrot.slane %v2913_v54, %v5446_v0 }
 0xb7a   : > { %2979 = vrot.lane.b32.xlu1 %v2977_v59, %s5080_s7  ;;  %v2982_v10 = vcombine.high %v2977_v59, %v5078_v21  ;;  %v3116_v11 = vrot.slane %v3102_v5, %v5446_v0  ;;  %v2989_v18 = vrot.slane %v2977_v59, %v5446_v0 }
 0xb7c   : > { %v2996_v29 = vrot.slane %v2982_v10, %v5446_v0 }
 0xb7d   : > { %v5639_v1 = vpop.f32.mrb[20].mxu0 }
 0xb7e   : > { %v4790_v2 = vpop.f32.mrb[21].mxu0 }
 0xb7f   : > { %v2974_v3 = vpop.f32.mrb[22].mxu0 }
 0xb80   : > { %v4791_v4 = vpop.f32.mrb[23].mxu0 }
 0xbea   : > { %v3100_v6 = vpop.permute.xlu0 %3099 }
 0xbeb   : > { %v3117_v8 = vcombine.high %v3100_v6, %v5078_v21  ;;  %v3124_v9 = vrot.slane %v3100_v6, %v5446_v0 }
 0xbec   : > { %v2980_v13 = vpop.permute.xlu1 %2979 }
 0xbed   : > { %v3131_v14 = vrot.slane %v3117_v8, %v5446_v0  ;;  %v3132_v15 = vcombine.low %v3109_v7, %v3124_v9  ;;  %v3133_v16 = vcombine.high %v3109_v7, %v3124_v9  ;;  %v2997_v17 = vcombine.high %v2980_v13, %v5078_v21 }
 0xbee   : > { %v3004_v62 = vrot.slane %v2980_v13, %v5446_v0 }
 0xbef   : > { %v3140_v63 = vrot.slane %v3132_v15, %v5456_v12  ;;  %v3147_v19 = vrot.slane %v3133_v16, %v5456_v12  ;;  %v3148_v20 = vcombine.low %v3116_v11, %v3131_v14  ;;  %v3149_v22 = vcombine.high %v3116_v11, %v3131_v14 }
 0xbf0   : > { %v3011_v23 = vrot.slane %v2997_v17, %v5446_v0  ;;  %v3012_v24 = vcombine.low %v2989_v18, %v3004_v62  ;;  %v3013_v25 = vcombine.high %v2989_v18, %v3004_v62 }
 0xbf1   : > { %v3156_v26 = vrot.slane %v3148_v20, %v5456_v12  ;;  %v3163_v27 = vrot.slane %v3149_v22, %v5456_v12  ;;  %v3168_v28 = vcombine.low %v3140_v63, %v3147_v19  ;;  %v4588_v30 = vcombine.high %v3140_v63, %v3147_v19  ;;  %v4584_v20 = vld [vmem:[%s5341_s2 + $0x2] ss:$0 sm:$0xff] }
 0xbf2   : > { %v3020_v32 = vrot.slane %v3012_v24, %v5456_v12  ;;  %v3027_v33 = vrot.slane %v3013_v25, %v5456_v12  ;;  %v3028_v34 = vcombine.low %v2996_v29, %v3011_v23  ;;  %v3029_v36 = vcombine.high %v2996_v29, %v3011_v23 }
 0xbf3   : > { %v3175_v37 = vrot.slane %v3168_v28, %v5446_v0  ;;  %v3183_v38 = vrot.slane %v4588_v30, %v5446_v0  ;;  %v3184_v39 = vcombine.low %v3156_v26, %v3163_v27  ;;  %v4589_v41 = vcombine.high %v3156_v26, %v3163_v27 }
 0xbf4   : > { %v3036_v42 = vrot.slane %v3028_v34, %v5456_v12  ;;  %v3043_v43 = vrot.slane %v3029_v36, %v5456_v12  ;;  %v3048_v44 = vcombine.low %v3020_v32, %v3027_v33  ;;  %v4586_v45 = vcombine.high %v3020_v32, %v3027_v33 }
 0xbf5   : > { %v3191_v46 = vrot.slane %v3184_v39, %v5446_v0  ;;  %v3199_v47 = vrot.slane %v4589_v41, %v5446_v0  ;;  %v3200_v48 = vcombine.low %v3175_v37, %v3183_v38  ;;  %v2972_v22 = vadd.f32 %v4584_v20, %v5639_v1 }
 0xbf6   : > { %v3064_v31 = vcombine.low %v3036_v42, %v3043_v43  ;;  %v4587_v49 = vcombine.high %v3036_v42, %v3043_v43  ;;  %v3055_v50 = vrot.slane %v3048_v44, %v5446_v0  ;;  %v3063_v51 = vrot.slane %v4586_v45, %v5446_v0 }
 0xbf7   : > { %v3208_v52 = vcombine.low %v3191_v46, %v3199_v47  ;;  %v3207_v55 = vrot.slane %v3200_v48, %v5456_v12  ;;  %v3222_v26 = vcombine.high %v2972_v22, %v5078_v21  ;;  %v3229_v32 = vrot.slane %v2972_v22, %v5446_v0 }
 0xbf8   : > { %v3071_v53 = vrot.slane %v3064_v31, %v5446_v0  ;;  %v3079_v54 = vrot.slane %v4587_v49, %v5446_v0  ;;  %v3080_v58 = vcombine.low %v3055_v50, %v3063_v51 }
 0xbf9   : > { %v3215_v56 = vrot.slane %v3208_v52, %v5456_v12  ;;  %v3236_v1 = vrot.slane %v3222_v26, %v5446_v0 }
 0xbfa   : > { %v3088_v57 = vcombine.low %v3071_v53, %v3079_v54  ;;  %v3087_v4 = vrot.slane %v3080_v58, %v5456_v12 }
 0xbfb   : > { %v3216_v59 = vcombine.low %v3207_v55, %v3215_v56  ;;  %v3217_v60 = vcombine.high %v3207_v55, %v3215_v56 }
 0xbfc   : > { %v3095_v3 = vrot.slane %v3088_v57, %v5456_v12 }
 0xbfd   : > { %v3340_v61 = vpack.c.bf16 %v3216_v59, %v3216_v59  ;;  %v3341_v2 = vpack.c.bf16 %v3217_v60, %v3217_v60 }
 0xbfe   : > { %v3096_v7 = vcombine.low %v3087_v4, %v3095_v3  ;;  %v3097_v8 = vcombine.high %v3087_v4, %v3095_v3 }
 0xbff   : > { %v3346_v5 = vsel %vm2391_vm5, %v3340_v61, 0  ;;  %v3392_v6 = vsel %vm2391_vm5, %v3341_v2, 0 }
 0xc00   : > { %4793 = vmatpush3.bf16.xpose.msra.mxu1 %v3346_v5  ;;  %4799 = vmatpush3.bf16.xpose.msra.mxu0 %v3392_v6  ;;  %v3338_v9 = vpack.c.bf16 %v3096_v7, %v3096_v7  ;;  %v3339_v10 = vpack.c.bf16 %v3097_v8, %v3097_v8 }
 0xc01   : > { %4804 = vmatprep.subr.bf16.mxu1 %v5078_v21  ;;  %4810 = vmatprep.subr.bf16.mxu0 %v5078_v21 }
 0xc07   : > { %4795 = vmatmul.mubr.msk.bf16.vlgmr.msra.gmra.mrb[20].mxu1 %vm2391_vm5, %v3338_v9  ;;  %4801 = vmatmul.mubr.msk.bf16.vlgmr.msra.gmra.mrb[24].mxu0 %vm2391_vm5, %v3339_v10 }
 0xc08   : > { %4806 = vmatprep.mubr.msk.bf16.mxu1 %vm5079_vm3, %v5078_v21  ;;  %4812 = vmatprep.mubr.msk.bf16.mxu0 %vm5079_vm3, %v5078_v21 }
 0xcda   : > { %v3382_v11 = vpop.f32.mrb[20].mxu1  ;;  %v3428_v13 = vpop.f32.mrb[24].mxu0 }
 0xcdb   : > { %v4796_v14 = vpop.f32.mrb[21].mxu1  ;;  %v4802_v15 = vpop.f32.mrb[25].mxu0  ;;  %v3435_v16 = vsel %vm3434_vm6, %v3382_v11, -inf  ;;  %v3438_v17 = vsel %vm3434_vm6, %v3428_v13, -inf }
 0xcdc   : > { %3436 = vmax.xlane.f32.xlu0 %v3435_v16  ;;  %v3385_v18 = vpop.f32.mrb[22].mxu1  ;;  %3439 = vmax.xlane.f32.xlu1 %v3438_v17  ;;  %v3431_v62 = vpop.f32.mrb[26].mxu0  ;;  %v3675_v16 = vld [vmem:[%s5344_s24] sm:$0xff]  ;;  %v3676_v17 = vld [vmem:[%s5344_s24 + $0x8] sm:$0xff] }
 0xcdd   : > { %v4797_v63 = vpop.f32.mrb[23].mxu1  ;;  %v4803_v19 = vpop.f32.mrb[27].mxu0  ;;  %v3680_v18 = vpack.c.bf16 %v3676_v17, %v3675_v16  ;;  %v3764_v16 = vld [vmem:[%s5353_s16 + $0x10] sm:$0xff] }
 0xced   : > { %3219 = vrot.lane.b32.xlu1 %v2972_v22, %s5080_s7 }
 0xd69   : > { %v3437_v29 = vpop.xlane.xlu0 %3436  ;;  %v3440_v23 = vpop.xlane.xlu1 %3439 }
 0xd6a   : > { %v3441_v24 = vsub.f32 %v3382_v11, %v3437_v29  ;;  %v3442_v25 = vsub.f32 %v3428_v13, %v3440_v23 }
 0xd6c   : > { %v3443_v27 = vmul.f32 1.442695, %v3441_v24  ;;  %v3445_v28 = vmul.f32 1.442695, %v3442_v25 }
 0xd6d   : > { %v3220_v30 = vpop.permute.xlu1 %3219 }
 0xd6e   : > { %4988 = vpow2.f32 %v3443_v27  ;;  %v3237_v33 = vcombine.high %v3220_v30, %v5078_v21  ;;  %v3244_v34 = vrot.slane %v3220_v30, %v5446_v0 }
 0xd6f   : > { %4990 = vpow2.f32 %v3445_v28 }
 0xd70   : > { %v3251_v36 = vrot.slane %v3237_v33, %v5446_v0  ;;  %v3252_v37 = vcombine.low %v3229_v32, %v3244_v34  ;;  %v3253_v38 = vcombine.high %v3229_v32, %v3244_v34 }
 0xd72   : > { %v3260_v39 = vrot.slane %v3252_v37, %v5456_v12  ;;  %v3267_v41 = vrot.slane %v3253_v38, %v5456_v12  ;;  %v3268_v42 = vcombine.low %v3236_v1, %v3251_v36  ;;  %v3269_v43 = vcombine.high %v3236_v1, %v3251_v36  ;;  %v3677_v1 = vld [vmem:[%s5344_s24 + $0x10] sm:$0xff]  ;;  %v3678_v36 = vld [vmem:[%s5344_s24 + $0x18] sm:$0xff] }
 0xd74   : > { %v3276_v44 = vrot.slane %v3268_v42, %v5456_v12  ;;  %v3283_v45 = vrot.slane %v3269_v43, %v5456_v12  ;;  %v3288_v46 = vcombine.low %v3260_v39, %v3267_v41  ;;  %v4590_v47 = vcombine.high %v3260_v39, %v3267_v41 }
 0xd75   : > { %v3681_v42 = vpack.c.bf16 %v3678_v36, %v3677_v1  ;;  %v3825_v1 = vld [vmem:[%s5361_s12 + $0x28] sm:$0xff] }
 0xd76   : > { %v3295_v48 = vrot.slane %v3288_v46, %v5446_v0  ;;  %v3303_v31 = vrot.slane %v4590_v47, %v5446_v0  ;;  %v3304_v49 = vcombine.low %v3276_v44, %v3283_v45  ;;  %v4591_v50 = vcombine.high %v3276_v44, %v3283_v45 }
 0xd78   : > { %v4989_v51 = vpop.eup %4988  ;;  %v3311_v52 = vrot.slane %v3304_v49, %v5446_v0  ;;  %v3319_v53 = vrot.slane %v4591_v50, %v5446_v0  ;;  %v3320_v54 = vcombine.low %v3295_v48, %v3303_v31 }
 0xd79   : > { %v3447_v55 = vsel %vm3434_vm6, %v4989_v51, 0.0  ;;  %v4991_v56 = vpop.eup %4990 }
 0xd7a   : > { %3448 = vadd.xlane.f32.xlu0 %v3447_v55  ;;  %v3328_v57 = vcombine.low %v3311_v52, %v3319_v53  ;;  %v3327_v58 = vrot.slane %v3320_v54, %v5456_v12  ;;  %v3450_v60 = vsel %vm3434_vm6, %v4991_v56, 0.0 }
 0xd7c   : > { %v3335_v59 = vrot.slane %v3328_v57, %v5456_v12 }
 0xd7e   : > { %3451 = vadd.xlane.f32.xlu0 %v3450_v60  ;;  %v3336_v61 = vcombine.low %v3327_v58, %v3335_v59  ;;  %v3337_v2 = vcombine.high %v3327_v58, %v3335_v59 }
 0xd80   : > { %v3459_v3 = vpack.c.bf16 %v3336_v61, %v3336_v61  ;;  %v3460_v4 = vpack.c.bf16 %v3337_v2, %v3337_v2 }
 0xd82   : > { %v3466_v5 = vsel %vm3464_vm7, %v3459_v3, 0  ;;  %v3512_v6 = vsel %vm3464_vm7, %v3460_v4, 0 }
 0xd83   : > { %4805 = vmatpush3.bf16.msra.mxu1 %v3466_v5  ;;  %4811 = vmatpush3.bf16.msra.mxu0 %v3512_v6 }
 0xd84   : > { %4816 = vmatprep.subr.bf16.mxu1 %v5078_v21  ;;  %4824 = vmatprep.subr.bf16.mxu0 %v5078_v21 }
 0xe07   : > { %v3449_v7 = vpop.xlane.xlu0 %3448 }
 0xe08   : > { %4992 = vrcp.f32 %v3449_v7 }
 0xe0b   : > { %v3452_v8 = vpop.xlane.xlu0 %3451 }
 0xe0c   : > { %4994 = vrcp.f32 %v3452_v8 }
 0xe12   : > { %v4993_v9 = vpop.eup %4992 }
 0xe13   : > { %v3455_v10 = vmul.f32 %v4993_v9, %v4989_v51 }
 0xe15   : > { %v3457_v11 = vpack.c.bf16 %v3455_v10, %v3455_v10 }
 0xe16   : > { %v4995_v13 = vpop.eup %4994 }
 0xe17   : > { %v3456_v14 = vmul.f32 %v4995_v13, %v4991_v56  ;;  %4807 = vmatmul.mubr.msk.bf16.vlgmr.msra.gmra.mrb[24].mxu1 %vm3434_vm6, %v3457_v11  ;;  %v3762_v13 = vld [vmem:[%s5353_s16] sm:$0xff] }
 0xe18   : > { %4820 = vmatprep.mubr.msk.bf16.mxu1 %vm5079_vm3, %v5078_v21  ;;  %4817 = vmatpush3.bf16.msra.mxu1 %v3680_v18  ;;  %v3820_v18 = vld [vmem:[%s5361_s12] sm:$0xff] }
 0xe19   : > { %v3458_v15 = vpack.c.bf16 %v3456_v14, %v3456_v14  ;;  %4818 = vmatprep.subr.bf16.mxu1 %v5078_v21  ;;  %v3763_v14 = vld [vmem:[%s5353_s16 + $0x8] sm:$0xff] }
 0xe1b   : > { %4813 = vmatmul.mubr.msk.bf16.vlgmr.msra.gmra.mrb[28].mxu0 %vm3434_vm6, %v3458_v15  ;;  %v3767_v15 = vpack.c.bf16 %v3763_v14, %v3762_v13 }
 0xe1c   : > { %4828 = vmatprep.mubr.msk.bf16.mxu0 %vm5079_vm3, %v5078_v21  ;;  %4819 = vmatpush3.bf16.msra.mxu1 %v3681_v42 }
 0xe1d   : > { %4832 = vmatprep.subr.bf16.mxu1 %v5078_v21  ;;  %4825 = vmatpush3.bf16.msra.mxu0 %v3767_v15 }
 0xe1e   : > { %4826 = vmatprep.subr.bf16.mxu0 %v5078_v21 }
 0xeea   : > { %v3502_v62 = vpop.f32.mrb[24].mxu1 }
 0xeeb   : > { %v4808_v63 = vpop.f32.mrb[25].mxu1  ;;  %v3554_v20 = vcombine.high %v3502_v62, %v5078_v21  ;;  %v3561_v23 = vrot.slane %v3502_v62, %v5446_v0  ;;  %v3821_v62 = vld [vmem:[%s5361_s12 + $0x8] sm:$0xff] }
 0xeec   : > { %v3505_v19 = vpop.f32.mrb[26].mxu1  ;;  %v3822_v63 = vld [vmem:[%s5361_s12 + $0x10] sm:$0xff] }
 0xeed   : > { %v4809_v22 = vpop.f32.mrb[27].mxu1  ;;  %v3568_v28 = vrot.slane %v3554_v20, %v5446_v0  ;;  %v3829_v19 = vpack.c.bf16 %v3821_v62, %v3820_v18  ;;  %v3823_v20 = vld [vmem:[%s5361_s12 + $0x18] sm:$0xff] }
 0xeee   : > { %v3548_v29 = vpop.f32.mrb[28].mxu0  ;;  %v3830_v22 = vpack.c.bf16 %v3823_v20, %v3822_v63 }
 0xeef   : > { %v3569_v24 = vcombine.high %v3548_v29, %v5078_v21  ;;  %v3576_v25 = vrot.slane %v3548_v29, %v5446_v0  ;;  %v4814_v26 = vpop.f32.mrb[29].mxu0 }
 0xef0   : > { %v3551_v27 = vpop.f32.mrb[30].mxu0  ;;  %v4600_v26 = vld [vmem:[%s1380_s19] ss:$0 sm:$0xff] }
 0xef1   : > { %v3583_v30 = vrot.slane %v3569_v24, %v5446_v0  ;;  %v3584_v32 = vcombine.low %v3561_v23, %v3576_v25  ;;  %v3585_v33 = vcombine.high %v3561_v23, %v3576_v25  ;;  %v4815_v34 = vpop.f32.mrb[31].mxu0 }
 0xef2   : > { %v3824_v34 = vld [vmem:[%s5361_s12 + $0x20] sm:$0xff] }
 0xef3   : > { %v3592_v37 = vrot.slane %v3584_v32, %v5456_v12  ;;  %v3599_v38 = vrot.slane %v3585_v33, %v5456_v12  ;;  %v3600_v39 = vcombine.low %v3568_v28, %v3583_v30  ;;  %v3601_v41 = vcombine.high %v3568_v28, %v3583_v30  ;;  %v4601_v28 = vld [vmem:[%s1383_s9] ss:$0 sm:$0xff] }
 0xef4   : > { %v3831_v36 = vpack.c.bf16 %v3825_v1, %v3824_v34 }
 0xef5   : > { %v3608_v43 = vrot.slane %v3600_v39, %v5456_v12  ;;  %v3615_v44 = vrot.slane %v3601_v41, %v5456_v12  ;;  %v3620_v45 = vcombine.low %v3592_v37, %v3599_v38  ;;  %v4596_v46 = vcombine.high %v3592_v37, %v3599_v38  ;;  %v3826_v37 = vld [vmem:[%s5361_s12 + $0x30] sm:$0xff]  ;;  %v3827_v38 = vld [vmem:[%s5361_s12 + $0x38] sm:$0xff]  ;;  %v4602_v41 = vld [vmem:[%s1391_s30] ss:$0 sm:$0xff]  ;;  %s5931_s30 = sld [smem:[#allocation34_spill]] }
 0xef6   : > { %v3832_v39 = vpack.c.bf16 %v3827_v38, %v3826_v37 }
 0xef7   : > { %v3627_v47 = vrot.slane %v3620_v45, %v5446_v0  ;;  %v3635_v48 = vrot.slane %v4596_v46, %v5446_v0  ;;  %v3636_v31 = vcombine.low %v3608_v43, %v3615_v44  ;;  %v4597_v49 = vcombine.high %v3608_v43, %v3615_v44 }
 0xef9   : > { %v3643_v50 = vrot.slane %v3636_v31, %v5446_v0  ;;  %v3651_v51 = vrot.slane %v4597_v49, %v5446_v0  ;;  %v3652_v52 = vcombine.low %v3627_v47, %v3635_v48  ;;  %v4598_v0 = vld [vmem:[%s1377_s25] ss:$0 sm:$0xff] }
 0xefa   : > { %v4604_v31 = vld [vmem:[%s1399_s22] ss:$0 sm:$0xff] }
 0xefb   : > { %v3660_v53 = vcombine.low %v3643_v50, %v3651_v51  ;;  %v3659_v54 = vrot.slane %v3652_v52, %v5456_v12  ;;  %p4608_p8 = scmp.ne.s32.totalorder %s5931_s30, 1 }
 0xefc   : > { %s5932_s12 = sld [smem:[#allocation28_spill]] (!%p4608_p8)  ;;  %s5933_s2 = sld [smem:[#allocation26_spill]] (!%p4608_p8)  ;;  %vm5085_vm9 = vmmov (!%p4608_p8), 0  }
 0xefd   : > { %v3667_v55 = vrot.slane %v3660_v53, %v5456_v12  ;;  %s5939_s7 = sld [smem:[#allocation27_spill]] (!%p4608_p8)  ;;  %s5941_s1 = sld [smem:[#allocation33_spill]] (!%p4608_p8) }
 0xeff   : > { %v3669_v56 = vcombine.high %v3659_v54, %v3667_v55  ;;  %v3668_v57 = vcombine.low %v3659_v54, %v3667_v55 }
 0xf01   : > { %3671 = vrot.lane.b32.xlu0 %v3669_v56, %s5083_s26  ;;  %s5940_s26 = sld [smem:[#allocation31_spill]] (!%p4608_p8) }
 0xf02   : > { %s5934_s22 = smov (!%p4608_p8), %s5933_s2  ;;  %v3980_v13 = vld [vmem:[%s5932_s12 + $0x18] sm:$0xff] (!%p4608_p8)  ;;  %v3919_v14 = vld [vmem:[%s5933_s2] sm:$0xff] (!%p4608_p8) }
 0xf03   : > { %v3920_v15 = vld [vmem:[%s5934_s22 + $0x8] sm:$0xff] (!%p4608_p8) }
 0xf73   : > { %v3672_v58 = vpop.permute.xlu0 %3671 }
 0xf74   : > { %v3674_v59 = vsel %vm2391_vm5, %v3668_v57, %v3672_v58 }
 0xf75   : > { %v3679_v60 = vpack.c.bf16 %v3674_v59, %v3674_v59 }
 0xf77   : > { %4821 = vmatmul.mubr.msk.bf16.vlgmr.msra.gmra.mrb[28].mxu1 %vm1627_vm4, %v3679_v60 }
 0xf78   : > { %4840 = vmatprep.mubr.msk.bf16.mxu1 %vm5079_vm3, %v5078_v21  ;;  %4833 = vmatpush3.bf16.msra.mxu1 %v3829_v19 }
 0xf79   : > { %4834 = vmatprep.subr.bf16.mxu1 %v5078_v21 }
 0xf7c   : > { %4835 = vmatpush3.bf16.msra.mxu1 %v3830_v22 }
 0xf7d   : > { %4836 = vmatprep.subr.bf16.mxu1 %v5078_v21 }
 0xf80   : > { %4837 = vmatpush3.bf16.msra.mxu1 %v3831_v36 }
 0xf81   : > { %4838 = vmatprep.subr.bf16.mxu1 %v5078_v21 }
 0xf84   : > { %4839 = vmatpush3.bf16.msra.mxu1 %v3832_v39 }
0x104a   : > { %v3726_v61 = vpop.f32.mrb[28].mxu1 }
0x104b   : > { %v3727_v2 = vadd.f32 %v4598_v0, %v3726_v61  ;;  %v4822_v12 = vpop.f32.mrb[29].mxu1 }
0x104c   : > { %v3729_v3 = vpop.f32.mrb[30].mxu1  ;;  %v4606_v12 = vld [vmem:[%s1402_s28] ss:$0 sm:$0xff]  ;;  %s5936_s28 = sld [smem:[#allocation32_spill]] (!%p4608_p8) }
0x104d   : > { %v4823_v4 = vpop.f32.mrb[31].mxu1  ;;  %v3732_v5 = vadd.f32 %v3727_v2, %v5614_v40  ;;  %v3765_v40 = vld [vmem:[%s5353_s16 + $0x18] sm:$0xff]  ;;  %s5938_s16 = sld [smem:[#allocation29_spill]] (!%p4608_p8) }
0x104e   : > { %v3768_v17 = vpack.c.bf16 %v3765_v40, %v3764_v16  ;;  %v4607_v4 = vld [vmem:[%s1405_s20] ss:$0 sm:$0xff]  ;;  %s5935_s20 = sld [smem:[#allocation30_spill]] (!%p4608_p8)  ;;  %v3924_v16 = vpack.c.bf16 (!%p4608_p8), %v3920_v15, %v3919_v14  ;;  %v3921_v40 = vld [vmem:[%s5934_s22 + $0x10] sm:$0xff] (!%p4608_p8) }
0x104f   : > { %v3735_v6 = vsel %vm1627_vm4, %v3732_v5, 0.0 }
0x1050   : > { %3736 = vadd.xlane.f32.xlu1 %v3735_v6  ;;  %4827 = vmatpush3.bf16.msra.mxu0 %v3768_v17  ;;  %v3922_v17 = vld [vmem:[%s5934_s22 + $0x18] sm:$0xff] (!%p4608_p8) }
0x1051   : > { %v3925_v62 = vpack.c.bf16 (!%p4608_p8), %v3922_v17, %v3921_v40 }
0x1052   : > { %s5937_s15 = smov (!%p4608_p8), %s5936_s28 }
0x1054   : > { %v4031_v63 = vld [vmem:[%s5935_s20] sm:$0xff] (!%p4608_p8)  ;;  %v4032_v19 = vld [vmem:[%s5935_s20 + $0x8] sm:$0xff] (!%p4608_p8) }
0x1055   : > { %v4036_v22 = vpack.c.bf16 (!%p4608_p8), %v4032_v19, %v4031_v63 }
0x10dd   : > { %v3737_v7 = vpop.xlane.xlu1 %3736 }
0x10de   : > { %v3738_v8 = vmul.f32 0.03125, %v3737_v7  ;;  %v3977_v7 = vld [vmem:[%s5932_s12] sm:$0xff] (!%p4608_p8) }
0x10e0   : > { %v3739_v9 = vsub.f32 %v3732_v5, %v3738_v8  ;;  %v3978_v8 = vld [vmem:[%s5932_s12 + $0x8] sm:$0xff] (!%p4608_p8) }
0x10e2   : > { %v3740_v10 = vmul.f32 %v3739_v9, %v3739_v9 }
0x10e4   : > { %v3741_v11 = vsel %vm1627_vm4, %v3740_v10, 0.0  ;;  %v5084_v10 = vmov (!%p4608_p8), 0.0  }
0x10e5   : > { %3742 = vadd.xlane.f32.xlu0 %v3741_v11  ;;  %4852 = vmatprep.subr.bf16.mxu1 (!%p4608_p8), %v5084_v10  ;;  %v3981_v11 = vpack.c.bf16 (!%p4608_p8), %v3978_v8, %v3977_v7 }
0x10e6   : > { %4844 = vmatprep.subr.bf16.mxu0 (!%p4608_p8), %v5084_v10 }
0x1172   : > { %v3743_v29 = vpop.xlane.xlu0 %3742 }
0x1173   : > { %v3744_v23 = vmul.f32 0.03125, %v3743_v29  ;;  %v4033_v29 = vld [vmem:[%s5935_s20 + $0x10] sm:$0xff] (!%p4608_p8) }
0x1175   : > { %v3745_v24 = vadd.f32 1e-05, %v3744_v23  ;;  %v4034_v23 = vld [vmem:[%s5935_s20 + $0x18] sm:$0xff] (!%p4608_p8) }
0x1177   : > { %4996 = vrsqrt.f32 %v3745_v24  ;;  %v4037_v24 = vpack.c.bf16 (!%p4608_p8), %v4034_v23, %v4033_v29 }
0x1181   : > { %v4997_v25 = vpop.eup %4996 }
0x1182   : > { %v3747_v27 = vmul.f32 %v4997_v25, %v3739_v9  ;;  %v3979_v9 = vld [vmem:[%s5932_s12 + $0x10] sm:$0xff] (!%p4608_p8)  ;;  %v4089_v25 = vld [vmem:[%s5936_s28] sm:$0xff] (!%p4608_p8) }
0x1183   : > { %v3982_v18 = vpack.c.bf16 (!%p4608_p8), %v3980_v13, %v3979_v9 }
0x1184   : > { %v3754_v30 = vmul.f32 %v4600_v26, %v3747_v27  ;;  %v4090_v26 = vld [vmem:[%s5937_s15 + $0x8] sm:$0xff] (!%p4608_p8) }
0x1185   : > { %v4094_v27 = vpack.c.bf16 (!%p4608_p8), %v4090_v26, %v4089_v25 }
0x1186   : > { %v3761_v32 = vadd.f32 %v4601_v28, %v3754_v30  ;;  %v4611_v28 = vld [vmem:[%s5938_s16] ss:$0 sm:$0xff] (!%p4608_p8) }
0x1187   : > { %v4609_v30 = vld [vmem:[%s5939_s7] ss:$0 sm:$0xff] (!%p4608_p8) }
0x1188   : > { %v3766_v33 = vpack.c.bf16 %v3761_v32, %v3761_v32 }
0x118a   : > { %4829 = vmatmul.mubr.msk.bf16.vlgmr.msra.gmra.mrb[32].mxu0 %vm1627_vm4, %v3766_v33 }
0x118b   : > { %4848 = vmatprep.mubr.msk.bf16.mxu0 (!%p4608_p8), %vm5085_vm9, %v5084_v10  ;;  %4845 = vmatpush3.bf16.msra.mxu0 (!%p4608_p8), %v3924_v16 }
0x118c   : > { %4846 = vmatprep.subr.bf16.mxu0 (!%p4608_p8), %v5084_v10 }
0x118f   : > { %4847 = vmatpush3.bf16.msra.mxu0 (!%p4608_p8), %v3925_v62 }
0x1190   : > { %4860 = vmatprep.subr.bf16.mxu0 (!%p4608_p8), %v5084_v10 }
0x125d   : > { %v3813_v42 = vpop.f32.mrb[32].mxu0 }
0x125e   : > { %v3814_v43 = vadd.f32 %v4602_v41, %v3813_v42  ;;  %v4830_v44 = vpop.f32.mrb[33].mxu0 }
0x125f   : > { %v3816_v45 = vpop.f32.mrb[34].mxu0 }
0x1260   : > { %v3819_v46 = vmax.f32 %v3814_v43, 0.0  ;;  %v4831_v47 = vpop.f32.mrb[35].mxu0  ;;  %v4091_v45 = vld [vmem:[%s5937_s15 + $0x10] sm:$0xff] (!%p4608_p8) }
0x1262   : > { %v3828_v48 = vpack.c.bf16 %v3819_v46, %v3819_v46  ;;  %v4092_v46 = vld [vmem:[%s5937_s15 + $0x18] sm:$0xff] (!%p4608_p8) }
0x1263   : > { %v4095_v47 = vpack.c.bf16 (!%p4608_p8), %v4092_v46, %v4091_v45 }
0x1264   : > { %4841 = vmatmul.mubr.msk.bf16.vlgmr.msra.gmra.mrb[32].mxu1 %vm3840_vm8, %v3828_v48  ;;  %v4613_v48 = vld [vmem:[%s5940_s26] ss:$0 sm:$0xff] (!%p4608_p8) }
0x1265   : > { %4856 = vmatprep.mubr.msk.bf16.mxu1 (!%p4608_p8), %vm5085_vm9, %v5084_v10  ;;  %4853 = vmatpush3.bf16.msra.mxu1 (!%p4608_p8), %v3981_v11 }
0x1266   : > { %4854 = vmatprep.subr.bf16.mxu1 (!%p4608_p8), %v5084_v10 }
0x1269   : > { %4855 = vmatpush3.bf16.msra.mxu1 (!%p4608_p8), %v3982_v18 }
0x126a   : > { %4868 = vmatprep.subr.bf16.mxu1 (!%p4608_p8), %v5084_v10 }
0x1337   : > { %v3878_v49 = vpop.f32.mrb[32].mxu1 }
0x1338   : > { %v3879_v50 = vadd.f32 %v4604_v31, %v3878_v49  ;;  %v4842_v21 = vpop.f32.mrb[33].mxu1 }
0x1339   : > { %v3881_v51 = vpop.f32.mrb[34].mxu1 }
0x133a   : > { %v4843_v52 = vpop.f32.mrb[35].mxu1  ;;  %v3884_v53 = vadd.f32 %v3879_v50, %v3761_v32 }
0x133c   : > { %v3887_v54 = vsel %vm1627_vm4, %v3884_v53, 0.0 }
0x133d   : > { %3888 = vadd.xlane.f32.xlu1 %v3887_v54  ;;  %v4615_v54 = vld [vmem:[%s5941_s1] ss:$0 sm:$0xff] (!%p4608_p8) }
0x13ca   : > { %v3889_v55 = vpop.xlane.xlu1 %3888 }
0x13cb   : > { %v3890_v56 = vmul.f32 0.03125, %v3889_v55 }
0x13cd   : > { %v3891_v57 = vsub.f32 %v3884_v53, %v3890_v56 }
0x13cf   : > { %v3892_v58 = vmul.f32 %v3891_v57, %v3891_v57 }
0x13d1   : > { %v3893_v59 = vsel %vm1627_vm4, %v3892_v58, 0.0 }
0x13d2   : > { %3894 = vadd.xlane.f32.xlu0 %v3893_v59 }
0x145f   : > { %v3895_v60 = vpop.xlane.xlu0 %3894 }
0x1460   : > { %v3896_v0 = vmul.f32 0.03125, %v3895_v60 }
0x1462   : > { %v3897_v61 = vadd.f32 1e-05, %v3896_v0 }
0x1464   : > { %4998 = vrsqrt.f32 %v3897_v61 }
0x146e   : > { %v4999_v2 = vpop.eup %4998 }
0x146f   : > { %v3899_v3 = vmul.f32 %v4999_v2, %v3891_v57  ;;  %3918 = sbr.rel (%p4608_p8) target bundleno = 6106 (0x17da), region = 168 }
0x1471   : > { %v3906_v5 = vmul.f32 %v4606_v12, %v3899_v3 }
0x1473   : > { %v3913_v6 = vadd.f32 %v4607_v4, %v3906_v5 }
0x1475   : > { %3914 = vst.msk [vmem:[#allocation2] sm:$0xff] %vm1627_vm4, %v3913_v6  ;;  %v3923_v20 = vpack.c.bf16 (!%p4608_p8), %v3913_v6, %v3913_v6 }
0x1477   : > { %4857 = vmatmul.mubr.msk.bf16.vlgmr.msra.gmra.mrb[0].mxu1 %vm1627_vm4, %v3923_v20  ;;  %4849 = vmatmul.mubr.msk.bf16.vlgmr.msra.gmra.mrb[0].mxu0 %vm1627_vm4, %v3923_v20 }
0x1478   : > { %4872 = vmatprep.mubr.msk.bf16.mxu1 %vm5085_vm9, %v5084_v10  ;;  %4861 = vmatpush3.bf16.msra.mxu0 %v4036_v22 }
0x1479   : > { %4864 = vmatprep.mubr.msk.bf16.mxu0 %vm5085_vm9, %v5084_v10  ;;  %4862 = vmatprep.subr.bf16.mxu0 %v5084_v10 }
0x147a   : > { %4869 = vmatpush3.bf16.msra.mxu1 %v4094_v27 }
0x147b   : > { %4870 = vmatprep.subr.bf16.mxu1 %v5084_v10 }
0x147c   : > { %4863 = vmatpush3.bf16.msra.mxu0 %v4037_v24 }
0x147d   : > { %4876 = vmatprep.subr.bf16.mxu0 %v5084_v10 }
0x147e   : > { %4871 = vmatpush3.bf16.msra.mxu1 %v4095_v47 }
0x154a   : > { %v4024_v32 = vpop.f32.mrb[0].mxu1  ;;  %v3970_v1 = vpop.f32.mrb[0].mxu0 }
0x154b   : > { %v4025_v33 = vadd.f32 %v4611_v28, %v4024_v32  ;;  %v4858_v34 = vpop.f32.mrb[1].mxu1  ;;  %v3971_v37 = vadd.f32 %v4609_v30, %v3970_v1  ;;  %v4850_v38 = vpop.f32.mrb[1].mxu0 }
0x154c   : > { %v4027_v36 = vpop.f32.mrb[2].mxu1  ;;  %v3973_v42 = vpop.f32.mrb[2].mxu0 }
0x154d   : > { %v4030_v39 = vmax.f32 %v4025_v33, 0.0  ;;  %v4859_v41 = vpop.f32.mrb[3].mxu1  ;;  %3976 = vst [vmem:[%s5368_s23] sm:$0xff] %v3971_v37  ;;  %v4851_v43 = vpop.f32.mrb[3].mxu0 }
0x154f   : > { %v4035_v44 = vpack.c.bf16 %v4030_v39, %v4030_v39 }
0x1551   : > { %4865 = vmatmul.mubr.msk.bf16.vlgmr.msra.gmra.mrb[4].mxu0 %vm1627_vm4, %v4035_v44 }
0x1552   : > { %4877 = vmatpush3.bf16.xpose.msra.mxu0 %v5421_v35  ;;  %4878 = vmatprep.mubr.msk.bf16.mxu0 %vm5085_vm9, %v5084_v10 }
0x1624   : > { %v4082_v31 = vpop.f32.mrb[4].mxu0 }
0x1625   : > { %v4083_v49 = vadd.f32 %v4613_v48, %v4082_v31  ;;  %v4866_v50 = vpop.f32.mrb[5].mxu0 }
0x1626   : > { %v4085_v21 = vpop.f32.mrb[6].mxu0 }
0x1627   : > { %v4088_v51 = vmax.f32 %v4083_v49, 0.0  ;;  %v4867_v52 = vpop.f32.mrb[7].mxu0 }
0x1629   : > { %v4093_v53 = vpack.c.bf16 %v4088_v51, %v4088_v51 }
0x162b   : > { %4873 = vmatmul.mubr.msk.bf16.vlgmr.msra.gmra.mrb[4].mxu1 %vm1627_vm4, %v4093_v53 }
0x16fe   : > { %v4140_v55 = vpop.f32.mrb[4].mxu1 }
0x16ff   : > { %v4141_v35 = vadd.f32 %v4615_v54, %v4140_v55  ;;  %v4874_v56 = vpop.f32.mrb[5].mxu1 }
0x1700   : > { %v4143_v57 = vpop.f32.mrb[6].mxu1 }
0x1701   : > { %v4146_v58 = vpack.c.bf16 %v4141_v35, %v4141_v35  ;;  %v4875_v59 = vpop.f32.mrb[7].mxu1 }
0x1703   : > { %4879 = vmatmul.mubr.msk.bf16.vlgmr.msra.gmra.mrb[8].mxu0 %vm1627_vm4, %v4146_v58 }
0x17d6   : > { %v4184_v60 = vpop.f32.mrb[8].mxu0 }
0x17d7   : > { %4190 = vst.msk [vmem:[%s5371_s14] sm:$0xff] %vm2391_vm5, %v4184_v60  ;;  %v4880_v0 = vpop.f32.mrb[9].mxu0 }
0x17d8   : > { %v4187_v61 = vpop.f32.mrb[10].mxu0 }
0x17d9   : > { %v4881_v2 = vpop.f32.mrb[11].mxu0 }
0x17da PF: > { %s5942_s23 = sld [smem:[#allocation37_spill]]  ;;  %s5943_s28 = sld [smem:[#allocation35_spill]] }
0x17db   : > { %s5944_s1 = sld [smem:[#allocation36_spill]]  ;;  %s5945_s2 = sld [smem:[#allocation38_spill]] }
0x17dc   : > { %s5946_s7 = sld [smem:[#allocation39_spill]] }
0x17e0   : > { %s84_s10 = sadd.s32 1, %s5942_s23  }
0x17e1   : > { %p81_p9 = scmp.ge.s32.totalorder %s84_s10, 6  }
0x17e3   :  { %83 = sbr.rel (!%p81_p9) target bundleno = 77 (0x4d), region = 308 }

</bundles_post_ra>
